<compile_context>
chip_gen: v5e
topology: v5e:2x2
jax: 0.10.0
libtpu: 0.0.40
codegen_flags: <defaults>
</compile_context>

<pallas_src>
import functools

import numpy as np
import jax
import jax.numpy as jnp
from jax import lax
from jax.experimental import pallas as pl
from jax.experimental.pallas import tpu as pltpu


_LIF_DEFAULT_TAU = 2.0   # spikingjelly LIFNode() default tau (used by the encoder LIFs)


# ---------------------------------------------------------------------------
# Fused kernel: one sample per grid step
# ---------------------------------------------------------------------------

def _fused_kernel(x_ref, w1_ref, b1_ref, qpair_ref, k2_ref, b2c_ref,
                  shift_ref, pool5_ref, wfc1_ref, wfc2_ref, bfc2_ref,
                  o_ref, *, T, tau, tau_enc, wpad):
    """Whole BrainNetv3_ forward for ONE sample.

    x_ref block: (1, 5, C, W1) -- axis 1 enumerates the width-5 window of
    MaxPool3d((2,1,5)) so the width pooling is an elementwise max.
    """
    w1 = w1_ref[...]                       # (8, C)   Conv2d(1,8,(C,1)).weight
    b1 = b1_ref[...]                       # (8, 1)

    # ---- encoder_1: Conv2d(1,8,(C,1)) + LIF (single step, v starts at 0) ----
    # LIF charge from v=0: v = y / tau_enc; spike = (v >= 1)  <=>  (y >= tau_enc)
    # (the 1/tau scale is folded into the threshold).
    pooled8 = None
    for d in range(5):
        y = jnp.dot(w1, x_ref[0, d], preferred_element_type=jnp.float32) + b1   # (8, W1)
        s = (y >= tau_enc).astype(jnp.float32)
        # width half of MaxPool3d((2,1,5)): max over the 5 window positions
        pooled8 = s if pooled8 is None else jnp.maximum(pooled8, s)             # (8, W1)
    # channel-pair half of the pool window: OR of row pairs via a 0/1 matmul
    p1 = (jnp.dot(qpair_ref[...], pooled8, preferred_element_type=jnp.float32)
          >= 0.5).astype(jnp.float32)                                           # (4, W1)

    # ---- encoder_2 conv: Conv2d(1,1,(3,3),pad=1) as 9 shifted MACs (VPU) ----
    # Width (+/-1) shifts come from ONE matmul with a constant shift matrix whose
    # three shifted copies sit at lane-aligned offsets; row shifts are cheap
    # axis-0 concats with a zero row.  No im2col, no per-pixel MXU work.
    W1n = p1.shape[1]
    k2 = k2_ref[...]                                                            # (3, 3)
    p1s = jnp.dot(p1, shift_ref[...], preferred_element_type=jnp.float32)       # (4, 3*wpad)
    zrow = jnp.zeros((1, p1s.shape[1]), jnp.float32)
    row_sh = (
        jnp.concatenate([zrow, p1s[0:3, :]], axis=0),   # di = -1
        p1s,                                            # di =  0
        jnp.concatenate([p1s[1:4, :], zrow], axis=0),   # di = +1
    )
    acc2 = None
    for a in range(3):
        rsa = row_sh[a]
        for b in range(3):
            term = k2[a:a + 1, b:b + 1] * rsa[:, b * wpad: b * wpad + W1n]
            acc2 = term if acc2 is None else acc2 + term
    c2 = acc2 + b2c_ref[...]                                                    # (4, W1)

    # ---- T-step spiking loop: encoder_2 LIF + MaxPool2d((2,5)) + classifier ----
    wfc1 = wfc1_ref[...]                   # (60, 30) = Linear(60,30).weight.T
    w1a = wfc1[0:30, :]                    # features h = 0
    w1b = wfc1[30:60, :]                   # features h = 1
    wfc2 = wfc2_ref[...]                   # (30, 2)  = Linear(30,2).weight.T
    bfc2 = bfc2_ref[...]                   # (1, 2)
    pool5 = pool5_ref[...]                 # (W1, 30) 0/1 width-5 pooling matrix
    inv_tau = 1.0 / tau
    inv_tau_e = 1.0 / tau_enc

    def lif(v, x, inv_t):
        # spikingjelly LIFNode (decay_input=True, hard reset, v_reset=0)
        v = v + (x - v) * inv_t                      # charge
        s = (v >= 1.0).astype(jnp.float32)           # fire (Heaviside)
        return v * (1.0 - s), s                      # reset

    def step(_, carry):
        v_e2, v_c1, v_c2, acc = carry
        v_e2, s_e2 = lif(v_e2, c2, inv_tau_e)                                   # (4, W1)
        # MaxPool2d((2,5)) + Flatten on 0/1 spikes == (row-pair sum) @ pool5 >= 0.5
        pair = jnp.concatenate([s_e2[0:1, :] + s_e2[1:2, :],
                                s_e2[2:3, :] + s_e2[3:4, :]], axis=0)           # (2, W1)
        pooled = (jnp.dot(pair, pool5, preferred_element_type=jnp.float32)
                  >= 0.5).astype(jnp.float32)                                   # (2, 30)
        # Linear(60,30,bias=False) on the flattened (h, w) features
        h1 = (jnp.dot(pooled[0:1, :], w1a, preferred_element_type=jnp.float32)
              + jnp.dot(pooled[1:2, :], w1b, preferred_element_type=jnp.float32))  # (1, 30)
        v_c1, s_c1 = lif(v_c1, h1, inv_tau)
        h2 = jnp.dot(s_c1, wfc2, preferred_element_type=jnp.float32) + bfc2     # (1, 2)
        v_c2, s_c2 = lif(v_c2, h2, inv_tau)
        return v_e2, v_c1, v_c2, acc + s_c2

    init = (jnp.zeros(c2.shape, jnp.float32),
            jnp.zeros((1, 30), jnp.float32),
            jnp.zeros((1, 2), jnp.float32),
            jnp.zeros((1, 2), jnp.float32))
    # T is static -> fully unrolled so the LLO scheduler can interleave steps.
    _, _, _, acc = lax.fori_loop(0, T, step, init, unroll=True)
    o_ref[0] = acc * (1.0 / T)


# ---------------------------------------------------------------------------
# Wrapper: single pallas_call, grid over the batch
# ---------------------------------------------------------------------------

def brainnet_v3_forward(x, params, *, T, tau):
    N, C, W = x.shape
    if W % 25 != 0:
        raise ValueError("W must be divisible by 25 (two exact /5 poolings)")
    W1 = W // 5
    W2 = W1 // 5
    if 2 * W2 != 60:
        raise ValueError("classifier Linear(60,30) requires W == 750")
    WPAD = ((W1 + 127) // 128) * 128   # lane-aligned stride for the shift copies

    # Input layout plumbing (single XLA transpose): split the first pooling
    # window out of the width -> (N, 5, C, W1); x5[n, d, c, w1] = x[n, c, 5*w1+d]
    x5 = jnp.transpose(x.reshape(N, C, W1, 5), (0, 3, 1, 2))

    # Small constant 0/1 matrices (numpy -> baked in at trace time).
    qpair = (np.arange(8)[None, :] // 2 == np.arange(4)[:, None]).astype(np.float32)   # (4, 8)
    ii = np.arange(W1)[:, None]
    jj = np.arange(W1)[None, :]
    shift = np.zeros((W1, 3 * WPAD), np.float32)          # three +-1 width-shift copies
    for b in range(3):
        shift[:, b * WPAD: b * WPAD + W1] = (ii == jj + (b - 1))
    pool5 = (ii // 5 == np.arange(W2)[None, :]).astype(np.float32)                     # (W1, 30)

    kernel = functools.partial(_fused_kernel, T=int(T), tau=float(tau),
                               tau_enc=_LIF_DEFAULT_TAU, wpad=WPAD)

    def full(shape):
        return pl.BlockSpec(shape, lambda n, _nd=len(shape): (0,) * _nd)

    out = pl.pallas_call(
        kernel,
        grid=(N,),
        in_specs=[
            pl.BlockSpec((1, 5, C, W1), lambda n: (n, 0, 0, 0)),   # x5: one sample per step
            full((8, C)),          # conv1 weight
            full((8, 1)),          # conv1 bias
            full((4, 8)),          # channel-pair pooling matrix
            full((3, 3)),          # conv2 weight
            full((1, 1)),          # conv2 bias
            full((W1, 3 * WPAD)),  # width shift matrix
            full((W1, W2)),        # width-5 pooling matrix
            full((60, 30)),        # fc1 weight (transposed)
            full((30, 2)),         # fc2 weight (transposed)
            full((1, 2)),          # fc2 bias
        ],
        out_specs=pl.BlockSpec((1, 1, 2), lambda n: (n, 0, 0)),
        out_shape=jax.ShapeDtypeStruct((N, 1, 2), jnp.float32),
        compiler_params=pltpu.CompilerParams(
            dimension_semantics=("parallel",),          # batch across TCs on v7x
            vmem_limit_bytes=32 * 1024 * 1024,
        ),
    )(x5, params["conv1_w"], params["conv1_b"].reshape(8, 1),
      jnp.asarray(qpair), params["conv2_w"], params["conv2_b"].reshape(1, 1),
      jnp.asarray(shift), jnp.asarray(pool5),
      params["fc1_w"], params["fc2_w"], params["fc2_b"].reshape(1, 2))
    return out.reshape(N, 2)


# ---------------------------------------------------------------------------
# Deterministic parameter init (shapes from the PyTorch __init__)
# ---------------------------------------------------------------------------

def init_params(key, channels=13):
    ks = jax.random.split(key, 7)

    def u(k, shape, fan_in):
        b = fan_in ** -0.5
        return jax.random.uniform(k, shape, jnp.float32, -b, b)

    return dict(
        conv1_w=u(ks[0], (8, channels), channels),   # Conv2d(1,8,(C,1)).weight squeezed to (8,C)
        conv1_b=u(ks[1], (8,), channels),
        conv2_w=u(ks[2], (3, 3), 9.0),               # Conv2d(1,1,(3,3)).weight squeezed to (3,3)
        conv2_b=u(ks[3], (1,), 9.0),
        fc1_w=u(ks[4], (60, 30), 60.0),              # Linear(60,30,bias=False).weight.T
        fc2_w=u(ks[5], (30, 2), 30.0),               # Linear(30,2).weight.T
        fc2_b=u(ks[6], (2,), 30.0),
    )


if __name__ == "__main__":
    key = jax.random.PRNGKey(0)
    kx, kp = jax.random.split(key)

    # W = 750 so that the two /5 poolings leave 30 columns -> Flatten yields 60
    # features, matching Linear(60, 30) exactly.
    N, C, W = 2, 13, 750
    T, tau = 4, 2.0

    x = 3.0 * jax.random.normal(kx, (N, C, W), jnp.float32)
    params = init_params(kp, channels=C)

    fwd = jax.jit(functools.partial(brainnet_v3_forward, T=T, tau=tau))
    out = jax.block_until_ready(fwd(x, params))

    assert out.shape == (N, 2), out.shape
    assert bool(jnp.all(jnp.isfinite(out)))
    print("KERNEL_OK")
</pallas_src>

<mosaic_0001>
module attributes {stable_mosaic.version = 11 : i64} {
  func.func @_fused_kernel(%arg0: i32, %arg1: memref<1x5x13x150xf32, #tpu.memory_space<vmem>>, %arg2: memref<8x13xf32, #tpu.memory_space<vmem>>, %arg3: memref<8x1xf32, #tpu.memory_space<vmem>>, %arg4: memref<4x8xf32, #tpu.memory_space<vmem>>, %arg5: memref<3x3xf32, #tpu.memory_space<vmem>>, %arg6: memref<1x1xf32, #tpu.memory_space<vmem>>, %arg7: memref<150x768xf32, #tpu.memory_space<vmem>>, %arg8: memref<150x30xf32, #tpu.memory_space<vmem>>, %arg9: memref<60x30xf32, #tpu.memory_space<vmem>>, %arg10: memref<30x2xf32, #tpu.memory_space<vmem>>, %arg11: memref<1x2xf32, #tpu.memory_space<vmem>>, %arg12: memref<1x1x2xf32, #tpu.memory_space<vmem>>) attributes {dimension_semantics = [#tpu.dimension_semantics<parallel>], iteration_bounds = array<i64: 2>, scalar_prefetch = 0 : i64, scratch_operands = 0 : i64, tpu.core_type = #tpu.core_type<tc>, window_params = [{transform_indices = @transform_0, window_bounds = array<i64: 1, 5, 13, 150>}, {pipeline_mode = #tpu.pipeline_mode<synchronous>, transform_indices = @transform_1, window_bounds = array<i64: 8, 13>}, {pipeline_mode = #tpu.pipeline_mode<synchronous>, transform_indices = @transform_2, window_bounds = array<i64: 8, 1>}, {pipeline_mode = #tpu.pipeline_mode<synchronous>, transform_indices = @transform_3, window_bounds = array<i64: 4, 8>}, {pipeline_mode = #tpu.pipeline_mode<synchronous>, transform_indices = @transform_4, window_bounds = array<i64: 3, 3>}, {pipeline_mode = #tpu.pipeline_mode<synchronous>, transform_indices = @transform_5, window_bounds = array<i64: 1, 1>}, {pipeline_mode = #tpu.pipeline_mode<synchronous>, transform_indices = @transform_6, window_bounds = array<i64: 150, 768>}, {pipeline_mode = #tpu.pipeline_mode<synchronous>, transform_indices = @transform_7, window_bounds = array<i64: 150, 30>}, {pipeline_mode = #tpu.pipeline_mode<synchronous>, transform_indices = @transform_8, window_bounds = array<i64: 60, 30>}, {pipeline_mode = #tpu.pipeline_mode<synchronous>, transform_indices = @transform_9, window_bounds = array<i64: 30, 2>}, {pipeline_mode = #tpu.pipeline_mode<synchronous>, transform_indices = @transform_10, window_bounds = array<i64: 1, 2>}, {transform_indices = @transform_11, window_bounds = array<i64: 1, 1, 2>}]} {
    %c0 = arith.constant 0 : index
    %c0_0 = arith.constant 0 : index
    %0 = vector.load %arg2[%c0, %c0_0] : memref<8x13xf32, #tpu.memory_space<vmem>>, vector<8x13xf32>
    %c0_1 = arith.constant 0 : index
    %c0_2 = arith.constant 0 : index
    %1 = vector.load %arg3[%c0_1, %c0_2] : memref<8x1xf32, #tpu.memory_space<vmem>>, vector<8x1xf32>
    %c0_3 = arith.constant 0 : index
    %c0_4 = arith.constant 0 : index
    %c0_5 = arith.constant 0 : index
    %c0_6 = arith.constant 0 : index
    %2 = vector.load %arg1[%c0_3, %c0_4, %c0_5, %c0_6] : memref<1x5x13x150xf32, #tpu.memory_space<vmem>>, vector<1x1x13x150xf32>
    %3 = vector.shape_cast %2 : vector<1x1x13x150xf32> to vector<13x150xf32>
    %cst = arith.constant dense<0.000000e+00> : vector<8x150xf32>
    %4 = tpu.matmul %0, %3, %cst {dimension_numbers = #tpu.dot_dimension_numbers<[1], [0], [0], [1], [0, 0, 1, 1], [], []>} : vector<8x13xf32>, vector<13x150xf32>, vector<8x150xf32> -> vector<8x150xf32>
    %5 = vector.broadcast %1 : vector<8x1xf32> to vector<8x150xf32>
    %6 = arith.addf %4, %5 : vector<8x150xf32>
    %cst_7 = arith.constant 2.000000e+00 : f32
    %7 = vector.broadcast %cst_7 : f32 to vector<8x150xf32>
    %8 = arith.cmpf oge, %6, %7 : vector<8x150xf32>
    %9 = arith.extui %8 : vector<8x150xi1> to vector<8x150xi32>
    %10 = arith.sitofp %9 : vector<8x150xi32> to vector<8x150xf32>
    %c0_8 = arith.constant 0 : index
    %c1 = arith.constant 1 : index
    %c0_9 = arith.constant 0 : index
    %c0_10 = arith.constant 0 : index
    %11 = vector.load %arg1[%c0_8, %c1, %c0_9, %c0_10] : memref<1x5x13x150xf32, #tpu.memory_space<vmem>>, vector<1x1x13x150xf32>
    %12 = vector.shape_cast %11 : vector<1x1x13x150xf32> to vector<13x150xf32>
    %cst_11 = arith.constant dense<0.000000e+00> : vector<8x150xf32>
    %13 = tpu.matmul %0, %12, %cst_11 {dimension_numbers = #tpu.dot_dimension_numbers<[1], [0], [0], [1], [0, 0, 1, 1], [], []>} : vector<8x13xf32>, vector<13x150xf32>, vector<8x150xf32> -> vector<8x150xf32>
    %14 = vector.broadcast %1 : vector<8x1xf32> to vector<8x150xf32>
    %15 = arith.addf %13, %14 : vector<8x150xf32>
    %cst_12 = arith.constant 2.000000e+00 : f32
    %16 = vector.broadcast %cst_12 : f32 to vector<8x150xf32>
    %17 = arith.cmpf oge, %15, %16 : vector<8x150xf32>
    %18 = arith.extui %17 : vector<8x150xi1> to vector<8x150xi32>
    %19 = arith.sitofp %18 : vector<8x150xi32> to vector<8x150xf32>
    %20 = arith.maximumf %10, %19 : vector<8x150xf32>
    %c0_13 = arith.constant 0 : index
    %c2 = arith.constant 2 : index
    %c0_14 = arith.constant 0 : index
    %c0_15 = arith.constant 0 : index
    %21 = vector.load %arg1[%c0_13, %c2, %c0_14, %c0_15] : memref<1x5x13x150xf32, #tpu.memory_space<vmem>>, vector<1x1x13x150xf32>
    %22 = vector.shape_cast %21 : vector<1x1x13x150xf32> to vector<13x150xf32>
    %cst_16 = arith.constant dense<0.000000e+00> : vector<8x150xf32>
    %23 = tpu.matmul %0, %22, %cst_16 {dimension_numbers = #tpu.dot_dimension_numbers<[1], [0], [0], [1], [0, 0, 1, 1], [], []>} : vector<8x13xf32>, vector<13x150xf32>, vector<8x150xf32> -> vector<8x150xf32>
    %24 = vector.broadcast %1 : vector<8x1xf32> to vector<8x150xf32>
    %25 = arith.addf %23, %24 : vector<8x150xf32>
    %cst_17 = arith.constant 2.000000e+00 : f32
    %26 = vector.broadcast %cst_17 : f32 to vector<8x150xf32>
    %27 = arith.cmpf oge, %25, %26 : vector<8x150xf32>
    %28 = arith.extui %27 : vector<8x150xi1> to vector<8x150xi32>
    %29 = arith.sitofp %28 : vector<8x150xi32> to vector<8x150xf32>
    %30 = arith.maximumf %20, %29 : vector<8x150xf32>
    %c0_18 = arith.constant 0 : index
    %c3 = arith.constant 3 : index
    %c0_19 = arith.constant 0 : index
    %c0_20 = arith.constant 0 : index
    %31 = vector.load %arg1[%c0_18, %c3, %c0_19, %c0_20] : memref<1x5x13x150xf32, #tpu.memory_space<vmem>>, vector<1x1x13x150xf32>
    %32 = vector.shape_cast %31 : vector<1x1x13x150xf32> to vector<13x150xf32>
    %cst_21 = arith.constant dense<0.000000e+00> : vector<8x150xf32>
    %33 = tpu.matmul %0, %32, %cst_21 {dimension_numbers = #tpu.dot_dimension_numbers<[1], [0], [0], [1], [0, 0, 1, 1], [], []>} : vector<8x13xf32>, vector<13x150xf32>, vector<8x150xf32> -> vector<8x150xf32>
    %34 = vector.broadcast %1 : vector<8x1xf32> to vector<8x150xf32>
    %35 = arith.addf %33, %34 : vector<8x150xf32>
    %cst_22 = arith.constant 2.000000e+00 : f32
    %36 = vector.broadcast %cst_22 : f32 to vector<8x150xf32>
    %37 = arith.cmpf oge, %35, %36 : vector<8x150xf32>
    %38 = arith.extui %37 : vector<8x150xi1> to vector<8x150xi32>
    %39 = arith.sitofp %38 : vector<8x150xi32> to vector<8x150xf32>
    %40 = arith.maximumf %30, %39 : vector<8x150xf32>
    %c0_23 = arith.constant 0 : index
    %c4 = arith.constant 4 : index
    %c0_24 = arith.constant 0 : index
    %c0_25 = arith.constant 0 : index
    %41 = vector.load %arg1[%c0_23, %c4, %c0_24, %c0_25] : memref<1x5x13x150xf32, #tpu.memory_space<vmem>>, vector<1x1x13x150xf32>
    %42 = vector.shape_cast %41 : vector<1x1x13x150xf32> to vector<13x150xf32>
    %cst_26 = arith.constant dense<0.000000e+00> : vector<8x150xf32>
    %43 = tpu.matmul %0, %42, %cst_26 {dimension_numbers = #tpu.dot_dimension_numbers<[1], [0], [0], [1], [0, 0, 1, 1], [], []>} : vector<8x13xf32>, vector<13x150xf32>, vector<8x150xf32> -> vector<8x150xf32>
    %44 = vector.broadcast %1 : vector<8x1xf32> to vector<8x150xf32>
    %45 = arith.addf %43, %44 : vector<8x150xf32>
    %cst_27 = arith.constant 2.000000e+00 : f32
    %46 = vector.broadcast %cst_27 : f32 to vector<8x150xf32>
    %47 = arith.cmpf oge, %45, %46 : vector<8x150xf32>
    %48 = arith.extui %47 : vector<8x150xi1> to vector<8x150xi32>
    %49 = arith.sitofp %48 : vector<8x150xi32> to vector<8x150xf32>
    %50 = arith.maximumf %40, %49 : vector<8x150xf32>
    %c0_28 = arith.constant 0 : index
    %c0_29 = arith.constant 0 : index
    %51 = vector.load %arg4[%c0_28, %c0_29] : memref<4x8xf32, #tpu.memory_space<vmem>>, vector<4x8xf32>
    %cst_30 = arith.constant dense<0.000000e+00> : vector<4x150xf32>
    %52 = tpu.matmul %51, %50, %cst_30 {dimension_numbers = #tpu.dot_dimension_numbers<[1], [0], [0], [1], [0, 0, 1, 1], [], []>} : vector<4x8xf32>, vector<8x150xf32>, vector<4x150xf32> -> vector<4x150xf32>
    %cst_31 = arith.constant 5.000000e-01 : f32
    %53 = vector.broadcast %cst_31 : f32 to vector<4x150xf32>
    %54 = arith.cmpf oge, %52, %53 : vector<4x150xf32>
    %55 = arith.extui %54 : vector<4x150xi1> to vector<4x150xi32>
    %56 = arith.sitofp %55 : vector<4x150xi32> to vector<4x150xf32>
    %c0_32 = arith.constant 0 : index
    %c0_33 = arith.constant 0 : index
    %57 = vector.load %arg5[%c0_32, %c0_33] : memref<3x3xf32, #tpu.memory_space<vmem>>, vector<3x3xf32>
    %c0_34 = arith.constant 0 : index
    %c0_35 = arith.constant 0 : index
    %58 = vector.load %arg7[%c0_34, %c0_35] : memref<150x768xf32, #tpu.memory_space<vmem>>, vector<150x768xf32>
    %cst_36 = arith.constant dense<0.000000e+00> : vector<4x768xf32>
    %59 = tpu.matmul %56, %58, %cst_36 {dimension_numbers = #tpu.dot_dimension_numbers<[1], [0], [0], [1], [0, 0, 1, 1], [], []>} : vector<4x150xf32>, vector<150x768xf32>, vector<4x768xf32> -> vector<4x768xf32>
    %cst_37 = arith.constant 0.000000e+00 : f32
    %60 = vector.broadcast %cst_37 : f32 to vector<1x768xf32>
    %61 = vector.extract_strided_slice %59 {offsets = [0, 0], sizes = [3, 768], strides = [1, 1]} : vector<4x768xf32> to vector<3x768xf32>
    %62 = tpu.concatenate %60, %61 in 0 : vector<1x768xf32>, vector<3x768xf32> -> vector<4x768xf32>
    %63 = vector.extract_strided_slice %59 {offsets = [1, 0], sizes = [3, 768], strides = [1, 1]} : vector<4x768xf32> to vector<3x768xf32>
    %64 = tpu.concatenate %63, %60 in 0 : vector<3x768xf32>, vector<1x768xf32> -> vector<4x768xf32>
    %65 = vector.extract_strided_slice %57 {offsets = [0, 0], sizes = [1, 1], strides = [1, 1]} : vector<3x3xf32> to vector<1x1xf32>
    %66 = vector.extract_strided_slice %62 {offsets = [0, 0], sizes = [4, 150], strides = [1, 1]} : vector<4x768xf32> to vector<4x150xf32>
    %67 = vector.broadcast %65 : vector<1x1xf32> to vector<4x150xf32>
    %68 = arith.mulf %67, %66 : vector<4x150xf32>
    %69 = vector.extract_strided_slice %57 {offsets = [0, 1], sizes = [1, 1], strides = [1, 1]} : vector<3x3xf32> to vector<1x1xf32>
    %70 = vector.extract_strided_slice %62 {offsets = [0, 256], sizes = [4, 150], strides = [1, 1]} : vector<4x768xf32> to vector<4x150xf32>
    %71 = vector.broadcast %69 : vector<1x1xf32> to vector<4x150xf32>
    %72 = arith.mulf %71, %70 : vector<4x150xf32>
    %73 = arith.addf %68, %72 : vector<4x150xf32>
    %74 = vector.extract_strided_slice %57 {offsets = [0, 2], sizes = [1, 1], strides = [1, 1]} : vector<3x3xf32> to vector<1x1xf32>
    %75 = vector.extract_strided_slice %62 {offsets = [0, 512], sizes = [4, 150], strides = [1, 1]} : vector<4x768xf32> to vector<4x150xf32>
    %76 = vector.broadcast %74 : vector<1x1xf32> to vector<4x150xf32>
    %77 = arith.mulf %76, %75 : vector<4x150xf32>
    %78 = arith.addf %73, %77 : vector<4x150xf32>
    %79 = vector.extract_strided_slice %57 {offsets = [1, 0], sizes = [1, 1], strides = [1, 1]} : vector<3x3xf32> to vector<1x1xf32>
    %80 = vector.extract_strided_slice %59 {offsets = [0, 0], sizes = [4, 150], strides = [1, 1]} : vector<4x768xf32> to vector<4x150xf32>
    %81 = vector.broadcast %79 : vector<1x1xf32> to vector<4x150xf32>
    %82 = arith.mulf %81, %80 : vector<4x150xf32>
    %83 = arith.addf %78, %82 : vector<4x150xf32>
    %84 = vector.extract_strided_slice %57 {offsets = [1, 1], sizes = [1, 1], strides = [1, 1]} : vector<3x3xf32> to vector<1x1xf32>
    %85 = vector.extract_strided_slice %59 {offsets = [0, 256], sizes = [4, 150], strides = [1, 1]} : vector<4x768xf32> to vector<4x150xf32>
    %86 = vector.broadcast %84 : vector<1x1xf32> to vector<4x150xf32>
    %87 = arith.mulf %86, %85 : vector<4x150xf32>
    %88 = arith.addf %83, %87 : vector<4x150xf32>
    %89 = vector.extract_strided_slice %57 {offsets = [1, 2], sizes = [1, 1], strides = [1, 1]} : vector<3x3xf32> to vector<1x1xf32>
    %90 = vector.extract_strided_slice %59 {offsets = [0, 512], sizes = [4, 150], strides = [1, 1]} : vector<4x768xf32> to vector<4x150xf32>
    %91 = vector.broadcast %89 : vector<1x1xf32> to vector<4x150xf32>
    %92 = arith.mulf %91, %90 : vector<4x150xf32>
    %93 = arith.addf %88, %92 : vector<4x150xf32>
    %94 = vector.extract_strided_slice %57 {offsets = [2, 0], sizes = [1, 1], strides = [1, 1]} : vector<3x3xf32> to vector<1x1xf32>
    %95 = vector.extract_strided_slice %64 {offsets = [0, 0], sizes = [4, 150], strides = [1, 1]} : vector<4x768xf32> to vector<4x150xf32>
    %96 = vector.broadcast %94 : vector<1x1xf32> to vector<4x150xf32>
    %97 = arith.mulf %96, %95 : vector<4x150xf32>
    %98 = arith.addf %93, %97 : vector<4x150xf32>
    %99 = vector.extract_strided_slice %57 {offsets = [2, 1], sizes = [1, 1], strides = [1, 1]} : vector<3x3xf32> to vector<1x1xf32>
    %100 = vector.extract_strided_slice %64 {offsets = [0, 256], sizes = [4, 150], strides = [1, 1]} : vector<4x768xf32> to vector<4x150xf32>
    %101 = vector.broadcast %99 : vector<1x1xf32> to vector<4x150xf32>
    %102 = arith.mulf %101, %100 : vector<4x150xf32>
    %103 = arith.addf %98, %102 : vector<4x150xf32>
    %104 = vector.extract_strided_slice %57 {offsets = [2, 2], sizes = [1, 1], strides = [1, 1]} : vector<3x3xf32> to vector<1x1xf32>
    %105 = vector.extract_strided_slice %64 {offsets = [0, 512], sizes = [4, 150], strides = [1, 1]} : vector<4x768xf32> to vector<4x150xf32>
    %106 = vector.broadcast %104 : vector<1x1xf32> to vector<4x150xf32>
    %107 = arith.mulf %106, %105 : vector<4x150xf32>
    %108 = arith.addf %103, %107 : vector<4x150xf32>
    %c0_38 = arith.constant 0 : index
    %c0_39 = arith.constant 0 : index
    %109 = vector.load %arg6[%c0_38, %c0_39] : memref<1x1xf32, #tpu.memory_space<vmem>>, vector<1x1xf32>
    %110 = vector.broadcast %109 : vector<1x1xf32> to vector<4x150xf32>
    %111 = arith.addf %108, %110 : vector<4x150xf32>
    %c0_40 = arith.constant 0 : index
    %c0_41 = arith.constant 0 : index
    %112 = vector.load %arg9[%c0_40, %c0_41] : memref<60x30xf32, #tpu.memory_space<vmem>>, vector<60x30xf32>
    %113 = vector.extract_strided_slice %112 {offsets = [0, 0], sizes = [30, 30], strides = [1, 1]} : vector<60x30xf32> to vector<30x30xf32>
    %114 = vector.extract_strided_slice %112 {offsets = [30, 0], sizes = [30, 30], strides = [1, 1]} : vector<60x30xf32> to vector<30x30xf32>
    %c0_42 = arith.constant 0 : index
    %c0_43 = arith.constant 0 : index
    %115 = vector.load %arg10[%c0_42, %c0_43] : memref<30x2xf32, #tpu.memory_space<vmem>>, vector<30x2xf32>
    %c0_44 = arith.constant 0 : index
    %c0_45 = arith.constant 0 : index
    %116 = vector.load %arg11[%c0_44, %c0_45] : memref<1x2xf32, #tpu.memory_space<vmem>>, vector<1x2xf32>
    %c0_46 = arith.constant 0 : index
    %c0_47 = arith.constant 0 : index
    %117 = vector.load %arg8[%c0_46, %c0_47] : memref<150x30xf32, #tpu.memory_space<vmem>>, vector<150x30xf32>
    %cst_48 = arith.constant 0.000000e+00 : f32
    %118 = vector.broadcast %cst_48 : f32 to vector<4x150xf32>
    %cst_49 = arith.constant 0.000000e+00 : f32
    %119 = vector.broadcast %cst_49 : f32 to vector<1x30xf32>
    %cst_50 = arith.constant 0.000000e+00 : f32
    %120 = vector.broadcast %cst_50 : f32 to vector<1x2xf32>
    %cst_51 = arith.constant 0.000000e+00 : f32
    %121 = vector.broadcast %cst_51 : f32 to vector<1x2xf32>
    %c0_i32 = arith.constant 0 : i32
    %122 = arith.subf %111, %118 : vector<4x150xf32>
    %cst_52 = arith.constant 5.000000e-01 : f32
    %123 = vector.broadcast %cst_52 : f32 to vector<4x150xf32>
    %124 = arith.mulf %122, %123 : vector<4x150xf32>
    %125 = arith.addf %118, %124 : vector<4x150xf32>
    %cst_53 = arith.constant 1.000000e+00 : f32
    %126 = vector.broadcast %cst_53 : f32 to vector<4x150xf32>
    %127 = arith.cmpf oge, %125, %126 : vector<4x150xf32>
    %128 = arith.extui %127 : vector<4x150xi1> to vector<4x150xi32>
    %129 = arith.sitofp %128 : vector<4x150xi32> to vector<4x150xf32>
    %cst_54 = arith.constant 1.000000e+00 : f32
    %130 = vector.broadcast %cst_54 : f32 to vector<4x150xf32>
    %131 = arith.subf %130, %129 : vector<4x150xf32>
    %132 = arith.mulf %125, %131 : vector<4x150xf32>
    %133 = vector.extract_strided_slice %129 {offsets = [0, 0], sizes = [1, 150], strides = [1, 1]} : vector<4x150xf32> to vector<1x150xf32>
    %134 = vector.extract_strided_slice %129 {offsets = [1, 0], sizes = [1, 150], strides = [1, 1]} : vector<4x150xf32> to vector<1x150xf32>
    %135 = arith.addf %133, %134 : vector<1x150xf32>
    %136 = vector.extract_strided_slice %129 {offsets = [2, 0], sizes = [1, 150], strides = [1, 1]} : vector<4x150xf32> to vector<1x150xf32>
    %137 = vector.extract_strided_slice %129 {offsets = [3, 0], sizes = [1, 150], strides = [1, 1]} : vector<4x150xf32> to vector<1x150xf32>
    %138 = arith.addf %136, %137 : vector<1x150xf32>
    %139 = tpu.concatenate %135, %138 in 0 : vector<1x150xf32>, vector<1x150xf32> -> vector<2x150xf32>
    %cst_55 = arith.constant dense<0.000000e+00> : vector<2x30xf32>
    %140 = tpu.matmul %139, %117, %cst_55 {dimension_numbers = #tpu.dot_dimension_numbers<[1], [0], [0], [1], [0, 0, 1, 1], [], []>} : vector<2x150xf32>, vector<150x30xf32>, vector<2x30xf32> -> vector<2x30xf32>
    %cst_56 = arith.constant 5.000000e-01 : f32
    %141 = vector.broadcast %cst_56 : f32 to vector<2x30xf32>
    %142 = arith.cmpf oge, %140, %141 : vector<2x30xf32>
    %143 = arith.extui %142 : vector<2x30xi1> to vector<2x30xi32>
    %144 = arith.sitofp %143 : vector<2x30xi32> to vector<2x30xf32>
    %145 = vector.extract_strided_slice %144 {offsets = [0, 0], sizes = [1, 30], strides = [1, 1]} : vector<2x30xf32> to vector<1x30xf32>
    %cst_57 = arith.constant dense<0.000000e+00> : vector<1x30xf32>
    %146 = tpu.matmul %145, %113, %cst_57 {dimension_numbers = #tpu.dot_dimension_numbers<[1], [0], [0], [1], [0, 0, 1, 1], [], []>} : vector<1x30xf32>, vector<30x30xf32>, vector<1x30xf32> -> vector<1x30xf32>
    %147 = vector.extract_strided_slice %144 {offsets = [1, 0], sizes = [1, 30], strides = [1, 1]} : vector<2x30xf32> to vector<1x30xf32>
    %cst_58 = arith.constant dense<0.000000e+00> : vector<1x30xf32>
    %148 = tpu.matmul %147, %114, %cst_58 {dimension_numbers = #tpu.dot_dimension_numbers<[1], [0], [0], [1], [0, 0, 1, 1], [], []>} : vector<1x30xf32>, vector<30x30xf32>, vector<1x30xf32> -> vector<1x30xf32>
    %149 = arith.addf %146, %148 : vector<1x30xf32>
    %150 = arith.subf %149, %119 : vector<1x30xf32>
    %cst_59 = arith.constant 5.000000e-01 : f32
    %151 = vector.broadcast %cst_59 : f32 to vector<1x30xf32>
    %152 = arith.mulf %150, %151 : vector<1x30xf32>
    %153 = arith.addf %119, %152 : vector<1x30xf32>
    %cst_60 = arith.constant 1.000000e+00 : f32
    %154 = vector.broadcast %cst_60 : f32 to vector<1x30xf32>
    %155 = arith.cmpf oge, %153, %154 : vector<1x30xf32>
    %156 = arith.extui %155 : vector<1x30xi1> to vector<1x30xi32>
    %157 = arith.sitofp %156 : vector<1x30xi32> to vector<1x30xf32>
    %cst_61 = arith.constant 1.000000e+00 : f32
    %158 = vector.broadcast %cst_61 : f32 to vector<1x30xf32>
    %159 = arith.subf %158, %157 : vector<1x30xf32>
    %160 = arith.mulf %153, %159 : vector<1x30xf32>
    %cst_62 = arith.constant dense<0.000000e+00> : vector<1x2xf32>
    %161 = tpu.matmul %157, %115, %cst_62 {dimension_numbers = #tpu.dot_dimension_numbers<[1], [0], [0], [1], [0, 0, 1, 1], [], []>} : vector<1x30xf32>, vector<30x2xf32>, vector<1x2xf32> -> vector<1x2xf32>
    %162 = arith.addf %161, %116 : vector<1x2xf32>
    %163 = arith.subf %162, %120 : vector<1x2xf32>
    %cst_63 = arith.constant 5.000000e-01 : f32
    %164 = vector.broadcast %cst_63 : f32 to vector<1x2xf32>
    %165 = arith.mulf %163, %164 : vector<1x2xf32>
    %166 = arith.addf %120, %165 : vector<1x2xf32>
    %cst_64 = arith.constant 1.000000e+00 : f32
    %167 = vector.broadcast %cst_64 : f32 to vector<1x2xf32>
    %168 = arith.cmpf oge, %166, %167 : vector<1x2xf32>
    %169 = arith.extui %168 : vector<1x2xi1> to vector<1x2xi32>
    %170 = arith.sitofp %169 : vector<1x2xi32> to vector<1x2xf32>
    %cst_65 = arith.constant 1.000000e+00 : f32
    %171 = vector.broadcast %cst_65 : f32 to vector<1x2xf32>
    %172 = arith.subf %171, %170 : vector<1x2xf32>
    %173 = arith.mulf %166, %172 : vector<1x2xf32>
    %174 = arith.addf %121, %170 : vector<1x2xf32>
    %c1_i32 = arith.constant 1 : i32
    %175 = arith.subf %111, %132 : vector<4x150xf32>
    %cst_66 = arith.constant 5.000000e-01 : f32
    %176 = vector.broadcast %cst_66 : f32 to vector<4x150xf32>
    %177 = arith.mulf %175, %176 : vector<4x150xf32>
    %178 = arith.addf %132, %177 : vector<4x150xf32>
    %cst_67 = arith.constant 1.000000e+00 : f32
    %179 = vector.broadcast %cst_67 : f32 to vector<4x150xf32>
    %180 = arith.cmpf oge, %178, %179 : vector<4x150xf32>
    %181 = arith.extui %180 : vector<4x150xi1> to vector<4x150xi32>
    %182 = arith.sitofp %181 : vector<4x150xi32> to vector<4x150xf32>
    %cst_68 = arith.constant 1.000000e+00 : f32
    %183 = vector.broadcast %cst_68 : f32 to vector<4x150xf32>
    %184 = arith.subf %183, %182 : vector<4x150xf32>
    %185 = arith.mulf %178, %184 : vector<4x150xf32>
    %186 = vector.extract_strided_slice %182 {offsets = [0, 0], sizes = [1, 150], strides = [1, 1]} : vector<4x150xf32> to vector<1x150xf32>
    %187 = vector.extract_strided_slice %182 {offsets = [1, 0], sizes = [1, 150], strides = [1, 1]} : vector<4x150xf32> to vector<1x150xf32>
    %188 = arith.addf %186, %187 : vector<1x150xf32>
    %189 = vector.extract_strided_slice %182 {offsets = [2, 0], sizes = [1, 150], strides = [1, 1]} : vector<4x150xf32> to vector<1x150xf32>
    %190 = vector.extract_strided_slice %182 {offsets = [3, 0], sizes = [1, 150], strides = [1, 1]} : vector<4x150xf32> to vector<1x150xf32>
    %191 = arith.addf %189, %190 : vector<1x150xf32>
    %192 = tpu.concatenate %188, %191 in 0 : vector<1x150xf32>, vector<1x150xf32> -> vector<2x150xf32>
    %cst_69 = arith.constant dense<0.000000e+00> : vector<2x30xf32>
    %193 = tpu.matmul %192, %117, %cst_69 {dimension_numbers = #tpu.dot_dimension_numbers<[1], [0], [0], [1], [0, 0, 1, 1], [], []>} : vector<2x150xf32>, vector<150x30xf32>, vector<2x30xf32> -> vector<2x30xf32>
    %cst_70 = arith.constant 5.000000e-01 : f32
    %194 = vector.broadcast %cst_70 : f32 to vector<2x30xf32>
    %195 = arith.cmpf oge, %193, %194 : vector<2x30xf32>
    %196 = arith.extui %195 : vector<2x30xi1> to vector<2x30xi32>
    %197 = arith.sitofp %196 : vector<2x30xi32> to vector<2x30xf32>
    %198 = vector.extract_strided_slice %197 {offsets = [0, 0], sizes = [1, 30], strides = [1, 1]} : vector<2x30xf32> to vector<1x30xf32>
    %cst_71 = arith.constant dense<0.000000e+00> : vector<1x30xf32>
    %199 = tpu.matmul %198, %113, %cst_71 {dimension_numbers = #tpu.dot_dimension_numbers<[1], [0], [0], [1], [0, 0, 1, 1], [], []>} : vector<1x30xf32>, vector<30x30xf32>, vector<1x30xf32> -> vector<1x30xf32>
    %200 = vector.extract_strided_slice %197 {offsets = [1, 0], sizes = [1, 30], strides = [1, 1]} : vector<2x30xf32> to vector<1x30xf32>
    %cst_72 = arith.constant dense<0.000000e+00> : vector<1x30xf32>
    %201 = tpu.matmul %200, %114, %cst_72 {dimension_numbers = #tpu.dot_dimension_numbers<[1], [0], [0], [1], [0, 0, 1, 1], [], []>} : vector<1x30xf32>, vector<30x30xf32>, vector<1x30xf32> -> vector<1x30xf32>
    %202 = arith.addf %199, %201 : vector<1x30xf32>
    %203 = arith.subf %202, %160 : vector<1x30xf32>
    %cst_73 = arith.constant 5.000000e-01 : f32
    %204 = vector.broadcast %cst_73 : f32 to vector<1x30xf32>
    %205 = arith.mulf %203, %204 : vector<1x30xf32>
    %206 = arith.addf %160, %205 : vector<1x30xf32>
    %cst_74 = arith.constant 1.000000e+00 : f32
    %207 = vector.broadcast %cst_74 : f32 to vector<1x30xf32>
    %208 = arith.cmpf oge, %206, %207 : vector<1x30xf32>
    %209 = arith.extui %208 : vector<1x30xi1> to vector<1x30xi32>
    %210 = arith.sitofp %209 : vector<1x30xi32> to vector<1x30xf32>
    %cst_75 = arith.constant 1.000000e+00 : f32
    %211 = vector.broadcast %cst_75 : f32 to vector<1x30xf32>
    %212 = arith.subf %211, %210 : vector<1x30xf32>
    %213 = arith.mulf %206, %212 : vector<1x30xf32>
    %cst_76 = arith.constant dense<0.000000e+00> : vector<1x2xf32>
    %214 = tpu.matmul %210, %115, %cst_76 {dimension_numbers = #tpu.dot_dimension_numbers<[1], [0], [0], [1], [0, 0, 1, 1], [], []>} : vector<1x30xf32>, vector<30x2xf32>, vector<1x2xf32> -> vector<1x2xf32>
    %215 = arith.addf %214, %116 : vector<1x2xf32>
    %216 = arith.subf %215, %173 : vector<1x2xf32>
    %cst_77 = arith.constant 5.000000e-01 : f32
    %217 = vector.broadcast %cst_77 : f32 to vector<1x2xf32>
    %218 = arith.mulf %216, %217 : vector<1x2xf32>
    %219 = arith.addf %173, %218 : vector<1x2xf32>
    %cst_78 = arith.constant 1.000000e+00 : f32
    %220 = vector.broadcast %cst_78 : f32 to vector<1x2xf32>
    %221 = arith.cmpf oge, %219, %220 : vector<1x2xf32>
    %222 = arith.extui %221 : vector<1x2xi1> to vector<1x2xi32>
    %223 = arith.sitofp %222 : vector<1x2xi32> to vector<1x2xf32>
    %cst_79 = arith.constant 1.000000e+00 : f32
    %224 = vector.broadcast %cst_79 : f32 to vector<1x2xf32>
    %225 = arith.subf %224, %223 : vector<1x2xf32>
    %226 = arith.mulf %219, %225 : vector<1x2xf32>
    %227 = arith.addf %174, %223 : vector<1x2xf32>
    %c2_i32 = arith.constant 2 : i32
    %228 = arith.subf %111, %185 : vector<4x150xf32>
    %cst_80 = arith.constant 5.000000e-01 : f32
    %229 = vector.broadcast %cst_80 : f32 to vector<4x150xf32>
    %230 = arith.mulf %228, %229 : vector<4x150xf32>
    %231 = arith.addf %185, %230 : vector<4x150xf32>
    %cst_81 = arith.constant 1.000000e+00 : f32
    %232 = vector.broadcast %cst_81 : f32 to vector<4x150xf32>
    %233 = arith.cmpf oge, %231, %232 : vector<4x150xf32>
    %234 = arith.extui %233 : vector<4x150xi1> to vector<4x150xi32>
    %235 = arith.sitofp %234 : vector<4x150xi32> to vector<4x150xf32>
    %cst_82 = arith.constant 1.000000e+00 : f32
    %236 = vector.broadcast %cst_82 : f32 to vector<4x150xf32>
    %237 = arith.subf %236, %235 : vector<4x150xf32>
    %238 = arith.mulf %231, %237 : vector<4x150xf32>
    %239 = vector.extract_strided_slice %235 {offsets = [0, 0], sizes = [1, 150], strides = [1, 1]} : vector<4x150xf32> to vector<1x150xf32>
    %240 = vector.extract_strided_slice %235 {offsets = [1, 0], sizes = [1, 150], strides = [1, 1]} : vector<4x150xf32> to vector<1x150xf32>
    %241 = arith.addf %239, %240 : vector<1x150xf32>
    %242 = vector.extract_strided_slice %235 {offsets = [2, 0], sizes = [1, 150], strides = [1, 1]} : vector<4x150xf32> to vector<1x150xf32>
    %243 = vector.extract_strided_slice %235 {offsets = [3, 0], sizes = [1, 150], strides = [1, 1]} : vector<4x150xf32> to vector<1x150xf32>
    %244 = arith.addf %242, %243 : vector<1x150xf32>
    %245 = tpu.concatenate %241, %244 in 0 : vector<1x150xf32>, vector<1x150xf32> -> vector<2x150xf32>
    %cst_83 = arith.constant dense<0.000000e+00> : vector<2x30xf32>
    %246 = tpu.matmul %245, %117, %cst_83 {dimension_numbers = #tpu.dot_dimension_numbers<[1], [0], [0], [1], [0, 0, 1, 1], [], []>} : vector<2x150xf32>, vector<150x30xf32>, vector<2x30xf32> -> vector<2x30xf32>
    %cst_84 = arith.constant 5.000000e-01 : f32
    %247 = vector.broadcast %cst_84 : f32 to vector<2x30xf32>
    %248 = arith.cmpf oge, %246, %247 : vector<2x30xf32>
    %249 = arith.extui %248 : vector<2x30xi1> to vector<2x30xi32>
    %250 = arith.sitofp %249 : vector<2x30xi32> to vector<2x30xf32>
    %251 = vector.extract_strided_slice %250 {offsets = [0, 0], sizes = [1, 30], strides = [1, 1]} : vector<2x30xf32> to vector<1x30xf32>
    %cst_85 = arith.constant dense<0.000000e+00> : vector<1x30xf32>
    %252 = tpu.matmul %251, %113, %cst_85 {dimension_numbers = #tpu.dot_dimension_numbers<[1], [0], [0], [1], [0, 0, 1, 1], [], []>} : vector<1x30xf32>, vector<30x30xf32>, vector<1x30xf32> -> vector<1x30xf32>
    %253 = vector.extract_strided_slice %250 {offsets = [1, 0], sizes = [1, 30], strides = [1, 1]} : vector<2x30xf32> to vector<1x30xf32>
    %cst_86 = arith.constant dense<0.000000e+00> : vector<1x30xf32>
    %254 = tpu.matmul %253, %114, %cst_86 {dimension_numbers = #tpu.dot_dimension_numbers<[1], [0], [0], [1], [0, 0, 1, 1], [], []>} : vector<1x30xf32>, vector<30x30xf32>, vector<1x30xf32> -> vector<1x30xf32>
    %255 = arith.addf %252, %254 : vector<1x30xf32>
    %256 = arith.subf %255, %213 : vector<1x30xf32>
    %cst_87 = arith.constant 5.000000e-01 : f32
    %257 = vector.broadcast %cst_87 : f32 to vector<1x30xf32>
    %258 = arith.mulf %256, %257 : vector<1x30xf32>
    %259 = arith.addf %213, %258 : vector<1x30xf32>
    %cst_88 = arith.constant 1.000000e+00 : f32
    %260 = vector.broadcast %cst_88 : f32 to vector<1x30xf32>
    %261 = arith.cmpf oge, %259, %260 : vector<1x30xf32>
    %262 = arith.extui %261 : vector<1x30xi1> to vector<1x30xi32>
    %263 = arith.sitofp %262 : vector<1x30xi32> to vector<1x30xf32>
    %cst_89 = arith.constant 1.000000e+00 : f32
    %264 = vector.broadcast %cst_89 : f32 to vector<1x30xf32>
    %265 = arith.subf %264, %263 : vector<1x30xf32>
    %266 = arith.mulf %259, %265 : vector<1x30xf32>
    %cst_90 = arith.constant dense<0.000000e+00> : vector<1x2xf32>
    %267 = tpu.matmul %263, %115, %cst_90 {dimension_numbers = #tpu.dot_dimension_numbers<[1], [0], [0], [1], [0, 0, 1, 1], [], []>} : vector<1x30xf32>, vector<30x2xf32>, vector<1x2xf32> -> vector<1x2xf32>
    %268 = arith.addf %267, %116 : vector<1x2xf32>
    %269 = arith.subf %268, %226 : vector<1x2xf32>
    %cst_91 = arith.constant 5.000000e-01 : f32
    %270 = vector.broadcast %cst_91 : f32 to vector<1x2xf32>
    %271 = arith.mulf %269, %270 : vector<1x2xf32>
    %272 = arith.addf %226, %271 : vector<1x2xf32>
    %cst_92 = arith.constant 1.000000e+00 : f32
    %273 = vector.broadcast %cst_92 : f32 to vector<1x2xf32>
    %274 = arith.cmpf oge, %272, %273 : vector<1x2xf32>
    %275 = arith.extui %274 : vector<1x2xi1> to vector<1x2xi32>
    %276 = arith.sitofp %275 : vector<1x2xi32> to vector<1x2xf32>
    %cst_93 = arith.constant 1.000000e+00 : f32
    %277 = vector.broadcast %cst_93 : f32 to vector<1x2xf32>
    %278 = arith.subf %277, %276 : vector<1x2xf32>
    %279 = arith.mulf %272, %278 : vector<1x2xf32>
    %280 = arith.addf %227, %276 : vector<1x2xf32>
    %c3_i32 = arith.constant 3 : i32
    %281 = arith.subf %111, %238 : vector<4x150xf32>
    %cst_94 = arith.constant 5.000000e-01 : f32
    %282 = vector.broadcast %cst_94 : f32 to vector<4x150xf32>
    %283 = arith.mulf %281, %282 : vector<4x150xf32>
    %284 = arith.addf %238, %283 : vector<4x150xf32>
    %cst_95 = arith.constant 1.000000e+00 : f32
    %285 = vector.broadcast %cst_95 : f32 to vector<4x150xf32>
    %286 = arith.cmpf oge, %284, %285 : vector<4x150xf32>
    %287 = arith.extui %286 : vector<4x150xi1> to vector<4x150xi32>
    %288 = arith.sitofp %287 : vector<4x150xi32> to vector<4x150xf32>
    %cst_96 = arith.constant 1.000000e+00 : f32
    %289 = vector.broadcast %cst_96 : f32 to vector<4x150xf32>
    %290 = arith.subf %289, %288 : vector<4x150xf32>
    %291 = arith.mulf %284, %290 : vector<4x150xf32>
    %292 = vector.extract_strided_slice %288 {offsets = [0, 0], sizes = [1, 150], strides = [1, 1]} : vector<4x150xf32> to vector<1x150xf32>
    %293 = vector.extract_strided_slice %288 {offsets = [1, 0], sizes = [1, 150], strides = [1, 1]} : vector<4x150xf32> to vector<1x150xf32>
    %294 = arith.addf %292, %293 : vector<1x150xf32>
    %295 = vector.extract_strided_slice %288 {offsets = [2, 0], sizes = [1, 150], strides = [1, 1]} : vector<4x150xf32> to vector<1x150xf32>
    %296 = vector.extract_strided_slice %288 {offsets = [3, 0], sizes = [1, 150], strides = [1, 1]} : vector<4x150xf32> to vector<1x150xf32>
    %297 = arith.addf %295, %296 : vector<1x150xf32>
    %298 = tpu.concatenate %294, %297 in 0 : vector<1x150xf32>, vector<1x150xf32> -> vector<2x150xf32>
    %cst_97 = arith.constant dense<0.000000e+00> : vector<2x30xf32>
    %299 = tpu.matmul %298, %117, %cst_97 {dimension_numbers = #tpu.dot_dimension_numbers<[1], [0], [0], [1], [0, 0, 1, 1], [], []>} : vector<2x150xf32>, vector<150x30xf32>, vector<2x30xf32> -> vector<2x30xf32>
    %cst_98 = arith.constant 5.000000e-01 : f32
    %300 = vector.broadcast %cst_98 : f32 to vector<2x30xf32>
    %301 = arith.cmpf oge, %299, %300 : vector<2x30xf32>
    %302 = arith.extui %301 : vector<2x30xi1> to vector<2x30xi32>
    %303 = arith.sitofp %302 : vector<2x30xi32> to vector<2x30xf32>
    %304 = vector.extract_strided_slice %303 {offsets = [0, 0], sizes = [1, 30], strides = [1, 1]} : vector<2x30xf32> to vector<1x30xf32>
    %cst_99 = arith.constant dense<0.000000e+00> : vector<1x30xf32>
    %305 = tpu.matmul %304, %113, %cst_99 {dimension_numbers = #tpu.dot_dimension_numbers<[1], [0], [0], [1], [0, 0, 1, 1], [], []>} : vector<1x30xf32>, vector<30x30xf32>, vector<1x30xf32> -> vector<1x30xf32>
    %306 = vector.extract_strided_slice %303 {offsets = [1, 0], sizes = [1, 30], strides = [1, 1]} : vector<2x30xf32> to vector<1x30xf32>
    %cst_100 = arith.constant dense<0.000000e+00> : vector<1x30xf32>
    %307 = tpu.matmul %306, %114, %cst_100 {dimension_numbers = #tpu.dot_dimension_numbers<[1], [0], [0], [1], [0, 0, 1, 1], [], []>} : vector<1x30xf32>, vector<30x30xf32>, vector<1x30xf32> -> vector<1x30xf32>
    %308 = arith.addf %305, %307 : vector<1x30xf32>
    %309 = arith.subf %308, %266 : vector<1x30xf32>
    %cst_101 = arith.constant 5.000000e-01 : f32
    %310 = vector.broadcast %cst_101 : f32 to vector<1x30xf32>
    %311 = arith.mulf %309, %310 : vector<1x30xf32>
    %312 = arith.addf %266, %311 : vector<1x30xf32>
    %cst_102 = arith.constant 1.000000e+00 : f32
    %313 = vector.broadcast %cst_102 : f32 to vector<1x30xf32>
    %314 = arith.cmpf oge, %312, %313 : vector<1x30xf32>
    %315 = arith.extui %314 : vector<1x30xi1> to vector<1x30xi32>
    %316 = arith.sitofp %315 : vector<1x30xi32> to vector<1x30xf32>
    %cst_103 = arith.constant 1.000000e+00 : f32
    %317 = vector.broadcast %cst_103 : f32 to vector<1x30xf32>
    %318 = arith.subf %317, %316 : vector<1x30xf32>
    %319 = arith.mulf %312, %318 : vector<1x30xf32>
    %cst_104 = arith.constant dense<0.000000e+00> : vector<1x2xf32>
    %320 = tpu.matmul %316, %115, %cst_104 {dimension_numbers = #tpu.dot_dimension_numbers<[1], [0], [0], [1], [0, 0, 1, 1], [], []>} : vector<1x30xf32>, vector<30x2xf32>, vector<1x2xf32> -> vector<1x2xf32>
    %321 = arith.addf %320, %116 : vector<1x2xf32>
    %322 = arith.subf %321, %279 : vector<1x2xf32>
    %cst_105 = arith.constant 5.000000e-01 : f32
    %323 = vector.broadcast %cst_105 : f32 to vector<1x2xf32>
    %324 = arith.mulf %322, %323 : vector<1x2xf32>
    %325 = arith.addf %279, %324 : vector<1x2xf32>
    %cst_106 = arith.constant 1.000000e+00 : f32
    %326 = vector.broadcast %cst_106 : f32 to vector<1x2xf32>
    %327 = arith.cmpf oge, %325, %326 : vector<1x2xf32>
    %328 = arith.extui %327 : vector<1x2xi1> to vector<1x2xi32>
    %329 = arith.sitofp %328 : vector<1x2xi32> to vector<1x2xf32>
    %cst_107 = arith.constant 1.000000e+00 : f32
    %330 = vector.broadcast %cst_107 : f32 to vector<1x2xf32>
    %331 = arith.subf %330, %329 : vector<1x2xf32>
    %332 = arith.mulf %325, %331 : vector<1x2xf32>
    %333 = arith.addf %280, %329 : vector<1x2xf32>
    %cst_108 = arith.constant 2.500000e-01 : f32
    %334 = vector.broadcast %cst_108 : f32 to vector<1x2xf32>
    %335 = arith.mulf %333, %334 : vector<1x2xf32>
    %c0_109 = arith.constant 0 : index
    %c0_110 = arith.constant 0 : index
    %c0_111 = arith.constant 0 : index
    %336 = vector.load %arg12[%c0_109, %c0_110, %c0_111] : memref<1x1x2xf32, #tpu.memory_space<vmem>>, vector<1x1x2xf32>
    %337 = vector.shape_cast %336 : vector<1x1x2xf32> to vector<1x2xf32>
    %338 = vector.shape_cast %335 : vector<1x2xf32> to vector<1x1x2xf32>
    tpu.vector_store %arg12[%c0_109, %c0_110, %c0_111], %338 {strides = array<i32>} : memref<1x1x2xf32, #tpu.memory_space<vmem>>, vector<1x1x2xf32>,
    return
  }
  func.func @transform_0(%arg0: i32) -> (i32, i32, i32, i32) {
    %c0_i32 = arith.constant 0 : i32
    %c0_i32_0 = arith.constant 0 : i32
    %c0_i32_1 = arith.constant 0 : i32
    %c0_i32_2 = arith.constant 0 : i32
    return %arg0, %c0_i32, %c0_i32_0, %c0_i32_1 : i32, i32, i32, i32
  }
  func.func @transform_1(%arg0: i32) -> (i32, i32) {
    %c0_i32 = arith.constant 0 : i32
    %c0_i32_0 = arith.constant 0 : i32
    %c0_i32_1 = arith.constant 0 : i32
    return %c0_i32, %c0_i32_0 : i32, i32
  }
  func.func @transform_2(%arg0: i32) -> (i32, i32) {
    %c0_i32 = arith.constant 0 : i32
    %c0_i32_0 = arith.constant 0 : i32
    %c0_i32_1 = arith.constant 0 : i32
    return %c0_i32, %c0_i32_0 : i32, i32
  }
  func.func @transform_3(%arg0: i32) -> (i32, i32) {
    %c0_i32 = arith.constant 0 : i32
    %c0_i32_0 = arith.constant 0 : i32
    %c0_i32_1 = arith.constant 0 : i32
    return %c0_i32, %c0_i32_0 : i32, i32
  }
  func.func @transform_4(%arg0: i32) -> (i32, i32) {
    %c0_i32 = arith.constant 0 : i32
    %c0_i32_0 = arith.constant 0 : i32
    %c0_i32_1 = arith.constant 0 : i32
    return %c0_i32, %c0_i32_0 : i32, i32
  }
  func.func @transform_5(%arg0: i32) -> (i32, i32) {
    %c0_i32 = arith.constant 0 : i32
    %c0_i32_0 = arith.constant 0 : i32
    %c0_i32_1 = arith.constant 0 : i32
    return %c0_i32, %c0_i32_0 : i32, i32
  }
  func.func @transform_6(%arg0: i32) -> (i32, i32) {
    %c0_i32 = arith.constant 0 : i32
    %c0_i32_0 = arith.constant 0 : i32
    %c0_i32_1 = arith.constant 0 : i32
    return %c0_i32, %c0_i32_0 : i32, i32
  }
  func.func @transform_7(%arg0: i32) -> (i32, i32) {
    %c0_i32 = arith.constant 0 : i32
    %c0_i32_0 = arith.constant 0 : i32
    %c0_i32_1 = arith.constant 0 : i32
    return %c0_i32, %c0_i32_0 : i32, i32
  }
  func.func @transform_8(%arg0: i32) -> (i32, i32) {
    %c0_i32 = arith.constant 0 : i32
    %c0_i32_0 = arith.constant 0 : i32
    %c0_i32_1 = arith.constant 0 : i32
    return %c0_i32, %c0_i32_0 : i32, i32
  }
  func.func @transform_9(%arg0: i32) -> (i32, i32) {
    %c0_i32 = arith.constant 0 : i32
    %c0_i32_0 = arith.constant 0 : i32
    %c0_i32_1 = arith.constant 0 : i32
    return %c0_i32, %c0_i32_0 : i32, i32
  }
  func.func @transform_10(%arg0: i32) -> (i32, i32) {
    %c0_i32 = arith.constant 0 : i32
    %c0_i32_0 = arith.constant 0 : i32
    %c0_i32_1 = arith.constant 0 : i32
    return %c0_i32, %c0_i32_0 : i32, i32
  }
  func.func @transform_11(%arg0: i32) -> (i32, i32, i32) {
    %c0_i32 = arith.constant 0 : i32
    %c0_i32_0 = arith.constant 0 : i32
    %c0_i32_1 = arith.constant 0 : i32
    return %arg0, %c0_i32, %c0_i32_0 : i32, i32, i32
  }
}

</mosaic_0001>

<bundles_post_ra>
// kernel: brainnet_v3_forward.1
= control target key start
LH: loop header
LB: loop body
LE: loop exit
PB: predicated region body
PF: predicated region fallthrough
CT: control target
= control target key end

     0   :  { %s3384_s0 = inlined_call_operand.vmem [shape: f32[2,5,13,150], index: 0, kind: input, shape index: {}]   ;;  %s3385_s1 = inlined_call_operand.vmem [shape: f32[8,13], index: 1, kind: input, shape index: {}]   ;;  %s3386_s2 = inlined_call_operand.vmem [shape: f32[8,1], index: 2, kind: input, shape index: {}]   ;;  %s3387_s3 = inlined_call_operand.vmem [shape: f32[4,8], index: 3, kind: input, shape index: {}]   ;;  %s3388_s4 = inlined_call_operand.vmem [shape: f32[3,3], index: 4, kind: input, shape index: {}]   ;;  %s3389_s5 = inlined_call_operand.<no memory space> [shape: f32[1,1], index: 5, kind: input, shape index: {}]   ;;  %s3390_s6 = inlined_call_operand.vmem [shape: f32[150,768], index: 6, kind: input, shape index: {}]   ;;  %s3391_s7 = inlined_call_operand.vmem [shape: f32[150,30], index: 7, kind: input, shape index: {}]   ;;  %s3392_s8 = inlined_call_operand.vmem [shape: f32[60,30], index: 8, kind: input, shape index: {}]   ;;  %s3393_s9 = inlined_call_operand.vmem [shape: f32[30,2], index: 9, kind: input, shape index: {}]   ;;  %s3394_s10 = inlined_call_operand.vmem [shape: f32[1,2], index: 10, kind: input, shape index: {}]   ;;  %s3395_s11 = inlined_call_operand.hbm [shape: f32[2,1,2], index: 11, kind: output, shape index: {}]  }
   0x1   :  { %3397 = sst [smem:[#allocation6_spill]] %s3384_s0  ;;  %v16_v0 = vstv %s3389_s5 }
   0x2   :  { %3398 = sst [smem:[#allocation7_spill]] %s3385_s1  ;;  %17 = vst [vmem:[#allocation2] sm:$0x1] %v16_v0 }
   0x3   :  { %18 = vsyncpa [#allocation4], 0 }
   0x4   :  { %20 = vsyncpa [#allocation4 + $0x1], 0  ;;  %s2349_s19 = smov 0   ;;  %s2351_s20 = smov 0  }
   0x5   :  { %s2353_s21 = smov 0   ;;  %s2355_s22 = smov 0  }
   0x6 LB: > { %s2370_s5 = sadd.s32 4294967295, %s2279_s22   ;;  %s2024_s23 = sadd.s32 4294967294, %s2279_s22   ;;  %s2279_s22 = sphi %s2355_s22, %s3407_s22   ;;  %s2275_s21 = sphi %s2353_s21, %s3406_s21   ;;  %s2271_s20 = sphi %s2351_s20, %s3405_s20   ;;  %s2267_s19 = sphi %s2349_s19, %s3404_s19  }
   0x7   : > { %s2374_s24 = sadd.s32 1, %s2279_s22   ;;  %s269_s25 = sadd.s32 1, %s2275_s21 }
   0x8   : > { %s266_s26 = ssub.s32 %s2279_s22, %s2374_s24  ;;  %p279_p0 = scmp.ne.s32.totalorder %s2275_s21, %s2271_s20 }
   0x9   : > { %p267_p1 = scmp.eq.s32.totalorder %s266_s26, 0  ;;  %p280_p2 = scmp.eq.s32.totalorder %s2370_s5, 1 }
   0xa   : > { %p285_p3 = scmp.ne.s32.totalorder %s2271_s20, %s2267_s19  ;;  %p286_p4 = scmp.eq.s32.totalorder %s2024_s23, 1 }
   0xb   : > { %s2385_s27 = scalar_select %p267_p1, %s2275_s21, %s269_s25  }
   0xc   : > { %p2387_p5 = por %p280_p2, %p279_p0  ;;  %p2391_p6 = por %p286_p4, %p285_p3 }
   0xd   : > { %p2027_p7 = scmp.ge.s32.totalorder %s2279_s22, 1  ;;  %p342_p8 = scmp.lt.s32.totalorder %s2279_s22, 3 }
   0xf   : > { %p343_p9 = pnand %p2027_p7, %p342_p8 }
  0x10   : > { %p381_p10 = scmp.lt.s32.totalorder (!%p343_p9), %s2370_s5, 1  ;;  %s3401_s0 = sld [smem:[#allocation6_spill]] (!%p343_p9) }
  0x11   : > { %346 = sbr.rel (%p343_p9) target bundleno = 1389 (0x56d), region = 64  ;;  %s3402_s1 = sld [smem:[#allocation7_spill]] (!%p343_p9) }
  0x12   : > { %s3396_s16 = smov (!%p343_p9), 127  }
  0x16   : > { %v387_v1 = vld [vmem:[%s3386_s2] sm:$0xff]  ;;  %v2281_v2 = vmov 0   ;;  %s382_s13 = scalar_select %p381_p10, %s2370_s5, 1  ;;  %vm401_vm0 = vcmask 1044480   ;;  %vm397_vm1 = vcmask 105472   ;;  %vm860_vm2 = vcmask 1045504  }
  0x17   : > { %2214 = vset.pattern.permute.xlu0 %v2281_v2  ;;  %2215 = vset.pattern.permute.xlu1 %v2281_v2  ;;  %v386_v10 = vld [vmem:[%s3402_s1] sm:$0xff]  ;;  %v844_v37 = vld [vmem:[%s3390_s6 + $0x330] sm:$0xff]  ;;  %v2284_v38 = vmov 0.0   ;;  %vm691_vm11 = vcmask 64512   ;;  %vm856_vm14 = vcmask 179200  }
  0x18   : > { %394 = vperm.xlu0 %2214, %v387_v1   ;;  %s2151_s14 = smul.u32 160, %s382_s13  ;;  %v2457_v32 = vld [vmem:[%s3388_s4] sm:$0x7]  ;;  %s2282_s13 = smov 126   ;;  %v828_v52 = vld [vmem:[%s3390_s6 + $0x2b0] sm:$0xff] }
  0x19   : > { %v850_v33 = vld [vmem:[%s3390_s6 + $0x360] sm:$0x3f]  ;;  %1178 = vrot.lane.b32.xlu1 %v2457_v32, %s2282_s13  ;;  %2152 = vpush %v2457_v32  ;;  %v2490_v53 = vrot.slane %v2457_v32, 1  ;;  %v816_v0 = vld [vmem:[%s3390_s6 + $0x250] sm:$0xff] }
  0x1a   : > { %s2405_s17 = scalar_lea.vmem %s3401_s0, %s2151_s14  ;;  %v838_v42 = vld [vmem:[%s3390_s6 + $0x300] sm:$0xff]  ;;  %v832_v1 = vld [vmem:[%s3390_s6 + $0x2d0] sm:$0xff]  ;;  %s3403_s14 = smov 127  }
  0x1b   : > { %v390_v3 = vld [vmem:[%s2405_s17 + $0x10] sm:$0x1f]  ;;  %v2038_v5 = vld [vmem:[%s2405_s17 + $0x38] sm:$0x1f]  ;;  %v388_v6 = vld [vmem:[%s2405_s17] sm:$0xff]  ;;  %1204 = vrot.lane.b32.xlu2 %v2490_v53, %s2282_s13  ;;  %s379_s0 = sand.u32 1, %s2271_s20  }
  0x1c   : > { %v2037_v4 = vld [vmem:[%s2405_s17 + $0x30] sm:$0x1f]  ;;  %2029 = vmatpush.msk.msra.mxu0 %vm401_vm0, %v390_v3  ;;  %v2035_v7 = vld [vmem:[%s2405_s17 + $0x20] sm:$0xff]  ;;  %v2036_v8 = vld [vmem:[%s2405_s17 + $0x28] sm:$0xff]  ;;  %2041 = vmatpush.msk.msra.mxu3 %vm401_vm0, %v2038_v5 }
  0x1d   : > { %2039 = vmatpush.msk.msra.mxu2 %vm401_vm0, %v2037_v4  ;;  %v2048_v9 = vld [vmem:[%s2405_s17 + $0x58] sm:$0x1f]  ;;  %v2046_v11 = vld [vmem:[%s2405_s17 + $0x48] sm:$0xff]  ;;  %v2057_v13 = vld [vmem:[%s2405_s17 + $0x70] sm:$0x1f] }
  0x1e   : > { %423 = vmatpush.msra.mxu0 %v388_v6  ;;  %500 = vmatpush.msra.mxu3 %v2036_v8  ;;  %v391_v12 = vld [vmem:[%s2405_s17 + $0x18] sm:$0x1f]  ;;  %v389_v15 = vld [vmem:[%s2405_s17 + $0x8] sm:$0xff]  ;;  %v2055_v17 = vld [vmem:[%s2405_s17 + $0x60] sm:$0xff] }
  0x1f   : > { %480 = vmatpush.msra.mxu2 %v2035_v7  ;;  %2051 = vmatpush.msk.msra.mxu1 %vm401_vm0, %v2048_v9  ;;  %v2058_v14 = vld [vmem:[%s2405_s17 + $0x78] sm:$0x1f]  ;;  %v2056_v18 = vld [vmem:[%s2405_s17 + $0x68] sm:$0xff]  ;;  %v2047_v20 = vld [vmem:[%s2405_s17 + $0x50] sm:$0x1f] }
  0x20   : > { %2030 = vmatmul.msk.f32.vlgmr.msra.gmra.mxu0 %vm397_vm1, %v386_v10  ;;  %2040 = vmatmul.msk.f32.vlgmr.msra.gmra.mxu2 %vm397_vm1, %v386_v10  ;;  %v2068_v16 = vld [vmem:[%s2405_s17 + $0x98] sm:$0x1f]  ;;  %v2066_v19 = vld [vmem:[%s2405_s17 + $0x88] sm:$0xff]  ;;  %v2045_v21 = vld [vmem:[%s2405_s17 + $0x40] sm:$0xff] }
  0x21   : > { %2042 = vmatmul.msk.f32.vlgmr.msra.gmra.mxu3 %vm397_vm1, %v386_v10  ;;  %559 = vmatpush.msra.mxu1 %v2046_v11  ;;  %v2067_v22 = vld [vmem:[%s2405_s17 + $0x90] sm:$0x1f]  ;;  %v2065_v23 = vld [vmem:[%s2405_s17 + $0x80] sm:$0xff] }
  0x22   : > { %2052 = vmatmul.msk.f32.vlgmr.msra.gmra.mxu1 %vm397_vm1, %v386_v10  ;;  %2031 = vmatpush.msk.msrb.mxu0 %vm401_vm0, %v391_v12  ;;  %v834_v46 = vld [vmem:[%s3390_s6 + $0x2e0] sm:$0xff]  ;;  %v804_v9 = vld [vmem:[%s3390_s6 + $0x1f0] sm:$0xff] }
  0x23   : > { %2059 = vmatpush.msk.msrb.mxu2 %vm401_vm0, %v2057_v13  ;;  %2061 = vmatpush.msk.msrb.mxu3 %vm401_vm0, %v2058_v14  ;;  %v822_v58 = vld [vmem:[%s3390_s6 + $0x280] sm:$0xff] }
  0x24   : > { %443 = vmatpush.msrb.mxu0 %v389_v15  ;;  %2071 = vmatpush.msk.msrb.mxu1 %vm401_vm0, %v2068_v16  ;;  %v690_v3 = vld [vmem:[%s3387_s3] sm:$0xf] }
  0x25   : > { %598 = vmatpush.msrb.mxu2 %v2055_v17  ;;  %618 = vmatpush.msrb.mxu3 %v2056_v18  ;;  %v810_v5 = vld [vmem:[%s3390_s6 + $0x220] sm:$0xff]  ;;  %v792_v17 = vld [vmem:[%s3390_s6 + $0x190] sm:$0xff] }
  0x26   : > { %677 = vmatpush.msrb.mxu1 %v2066_v19  ;;  %2049 = vmatpush.msk.msra.mxu0 %vm401_vm0, %v2047_v20  ;;  %v826_v6 = vld [vmem:[%s3390_s6 + $0x2a0] sm:$0xff]  ;;  %v808_v18 = vld [vmem:[%s3390_s6 + $0x210] sm:$0xff]  ;;  %v833_v19 = vld [vmem:[%s3390_s6 + $0x2d8] sm:$0xff] }
  0x27   : > { %1169 = vrot.lane.b32.xlu0 %v2457_v32, %s3396_s16  ;;  %1195 = vrot.lane.b32.xlu1 %v2490_v53, %s3396_s16  ;;  %v798_v13 = vld [vmem:[%s3390_s6 + $0x1c0] sm:$0xff] }
  0x28   : > { %2032 = vmatmul.msk.f32.vlgmr.msrb.gmra.mxu0 %vm397_vm1, %v386_v10  ;;  %2060 = vmatmul.msk.f32.vlgmr.msrb.gmra.mxu2 %vm397_vm1, %v386_v10  ;;  %v814_v14 = vld [vmem:[%s3390_s6 + $0x240] sm:$0xff] }
  0x29   : > { %2062 = vmatmul.msk.f32.vlgmr.msrb.gmra.mxu3 %vm397_vm1, %v386_v10  ;;  %539 = vmatpush.msra.mxu0 %v2045_v21  ;;  %v786_v20 = vld [vmem:[%s3390_s6 + $0x160] sm:$0xff] }
  0x2a   : > { %2072 = vmatmul.msk.f32.vlgmr.msrb.gmra.mxu1 %vm397_vm1, %v386_v10  ;;  %v802_v21 = vld [vmem:[%s3390_s6 + $0x1e0] sm:$0xff] }
  0x2b   : > { %2069 = vmatpush.msk.msrb.mxu0 %vm401_vm0, %v2067_v22  ;;  %2080 = vmatpush.msk.msra.mxu1 %vm860_vm2, %v850_v33  ;;  %v827_v22 = vld [vmem:[%s3390_s6 + $0x2a8] sm:$0xff]  ;;  %v845_v33 = vld [vmem:[%s3390_s6 + $0x338] sm:$0xff] }
  0x2d   : > { %657 = vmatpush.msrb.mxu0 %v2065_v23  ;;  %913 = vmatpush.msra.mxu1 %v844_v37  ;;  %v780_v23 = vld [vmem:[%s3390_s6 + $0x130] sm:$0xff]  ;;  %v839_v37 = vld [vmem:[%s3390_s6 + $0x308] sm:$0xff] }
  0x2f   : > { %914 = vmatpush.msra.mxu1 %v838_v42  ;;  %v772_v42 = vld [vmem:[%s3390_s6 + $0xf0] sm:$0xff] }
  0x30   : > { %2050 = vmatmul.msk.f32.vlgmr.msra.gmra.mxu0 %vm397_vm1, %v386_v10 }
  0x31   : > { %959 = vmatpush.msrb.mxu1 %v834_v46  ;;  %879 = vmatpush.msra.mxu0 %v832_v1  ;;  %v779_v46 = vld [vmem:[%s3390_s6 + $0x128] sm:$0xff]  ;;  %v840_v1 = vld [vmem:[%s3390_s6 + $0x310] sm:$0xff] }
  0x33   : > { %960 = vmatpush.msrb.mxu1 %v828_v52  ;;  %880 = vmatpush.msra.mxu0 %v826_v6  ;;  %v743_v52 = vld [vmem:[%s3390_s6 + $0x8] sm:$0xff]  ;;  %v782_v6 = vld [vmem:[%s3390_s6 + $0x140] sm:$0xff] }
  0x35   : > { %961 = vmatpush.msrb.mxu1 %v822_v58  ;;  %v812_v58 = vld [vmem:[%s3390_s6 + $0x230] sm:$0xff] }
  0x37   : > { %962 = vmatpush.msrb.mxu1 %v816_v0  ;;  %v744_v0 = vld [vmem:[%s3390_s6 + $0x10] sm:$0xff] }
  0x38   : > { %2070 = vmatmul.msk.f32.vlgmr.msrb.gmra.mxu0 %vm397_vm1, %v386_v10  ;;  %v820_v10 = vld [vmem:[%s3390_s6 + $0x270] sm:$0xff]  ;;  %vm1137_vm1 = vcmask 1040384  }
  0x39   : > { %963 = vmatpush.msrb.mxu1 %v810_v5  ;;  %881 = vmatpush.msra.mxu0 %v820_v10  ;;  %v754_v5 = vld [vmem:[%s3390_s6 + $0x60] sm:$0xff] }
  0x3a   : > { %v770_v10 = vld [vmem:[%s3390_s6 + $0xe0] sm:$0xff] }
  0x3b   : > { %964 = vmatpush.msrb.mxu1 %v804_v9  ;;  %882 = vmatpush.msra.mxu0 %v814_v14  ;;  %v742_v9 = vld [vmem:[%s3390_s6] sm:$0xff]  ;;  %v847_v14 = vld [vmem:[%s3390_s6 + $0x348] sm:$0xff] }
  0x3d   : > { %965 = vmatpush.msrb.mxu1 %v798_v13  ;;  %883 = vmatpush.msra.mxu0 %v808_v18  ;;  %v758_v13 = vld [vmem:[%s3390_s6 + $0x80] sm:$0xff] }
  0x3f   : > { %966 = vmatpush.msrb.mxu1 %v792_v17  ;;  %884 = vmatpush.msra.mxu0 %v802_v21  ;;  %v746_v17 = vld [vmem:[%s3390_s6 + $0x20] sm:$0xff] }
  0x41   : > { %967 = vmatpush.msrb.mxu1 %v786_v20  ;;  %v837_v20 = vld [vmem:[%s3390_s6 + $0x2f8] sm:$0xff] }
  0x43   : > { %968 = vmatpush.msrb.mxu1 %v780_v23  ;;  %v831_v23 = vld [vmem:[%s3390_s6 + $0x2c8] sm:$0xff] }
  0x4a   : > { %s2978_s16 = spop %2152 }
  0x8a   : > { %v2450_v27 = vpop.permute.xlu0 %394 }
  0x9d   : > { %v425_v24 = vpop.f32.mrf.mxu0 }
  0x9e   : > { %v426_v40 = vadd.f32 %v425_v24, %v2450_v27  ;;  %v2559_v24 = vrot.slane %v2457_v32, 2  ;;  %v784_v32 = vld [vmem:[%s3390_s6 + $0x150] sm:$0xff] }
  0x9f   : > { %v561_v25 = vpop.f32.mrf.mxu1 }
  0xa0   : > { %v562_v34 = vadd.f32 %v561_v25, %v2450_v27  ;;  %vm448_vm7 = vcmp.ge.f32.partialorder %v426_v40, 2.0  ;;  %v796_v25 = vld [vmem:[%s3390_s6 + $0x1b0] sm:$0xff]  ;;  %1230 = vrot.lane.b32.xlu0 %v2559_v24, %s2282_s13  ;;  %1221 = vrot.lane.b32.xlu2 %v2559_v24, %s3403_s14  ;;  %s2237_s13 = scalar_lea.hbm %s3395_s11, 2 }
  0xa1   : > { %v2033_v59 = vsel %vm448_vm7, 1.0, %v2284_v38  ;;  %885 = vmatpush.msra.mxu0 %v796_v25  ;;  %v756_v40 = vld [vmem:[%s3390_s6 + $0x70] sm:$0xff]  ;;  %v2216_v25 = vld [vmem:[#allocation2] ss:$0 sm:$0xff] }
  0xa2   : > { %vm565_vm5 = vcmp.ge.f32.partialorder %v562_v34, 2.0  ;;  %v809_v34 = vld [vmem:[%s3390_s6 + $0x218] sm:$0xff]  ;;  %1243 = vperm.xlu1 %2215, %v2216_v25  }
  0xa3   : > { %v482_v26 = vpop.f32.mrf.mxu2  ;;  %v2054_v50 = vsel %vm565_vm5, 1.0, %v2284_v38 }
  0xa4   : > { %v502_v28 = vpop.f32.mrf.mxu3  ;;  %v483_v35 = vadd.f32 %v482_v26, %v2450_v27  ;;  %v821_v26 = vld [vmem:[%s3390_s6 + $0x278] sm:$0xff] }
  0xa5   : > { %v503_v29 = vadd.f32 %v502_v28, %v2450_v27  ;;  %v445_v30 = vpop.f32.mrf.mxu0  ;;  %v790_v28 = vld [vmem:[%s3390_s6 + $0x180] sm:$0xff] }
  0xa6   : > { %v446_v31 = vadd.f32 %v445_v30, %v2450_v27  ;;  %vm505_vm6 = vcmp.ge.f32.partialorder %v483_v35, 2.0  ;;  %v815_v30 = vld [vmem:[%s3390_s6 + $0x248] sm:$0xff]  ;;  %886 = vmatpush.msra.mxu0 %v790_v28  ;;  %v762_v35 = vld [vmem:[%s3390_s6 + $0xa0] sm:$0xff]  ;;  %v1205_v28 = vpop.permute.xlu2 %1204 }
  0xa7   : > { %vm506_vm3 = vcmp.ge.f32.partialorder %v503_v29, 2.0  ;;  %v679_v36 = vpop.f32.mrf.mxu1  ;;  %v2043_v54 = vsel %vm505_vm6, 1.0, %v2284_v38  ;;  %v851_v29 = vld [vmem:[%s3390_s6 + $0x368] sm:$0x3f] }
  0xa8   : > { %vm449_vm4 = vcmp.ge.f32.partialorder %v446_v31, 2.0  ;;  %v2044_v41 = vsel %vm506_vm3, 1.0, %v2284_v38  ;;  %v680_v44 = vadd.f32 %v679_v36, %v2450_v27  ;;  %v511_v62 = vmax.f32 %v2033_v59, %v2043_v54  ;;  %v768_v31 = vld [vmem:[%s3390_s6 + $0xd0] sm:$0xff]  ;;  %v778_v36 = vld [vmem:[%s3390_s6 + $0x120] sm:$0xff]  ;;  %887 = vmatpush.msra.mxu0 %v784_v32  ;;  %v817_v32 = vld [vmem:[%s3390_s6 + $0x258] sm:$0xff] }
  0xa9   : > { %v2034_v39 = vsel %vm449_vm4, 1.0, %v2284_v38  ;;  %v836_v54 = vld [vmem:[%s3390_s6 + $0x2f0] sm:$0xff]  ;;  %v806_v59 = vld [vmem:[%s3390_s6 + $0x200] sm:$0xff]  ;;  %vm1156_vm3 = vcmask 1042432  }
  0xaa   : > { %v512_v43 = vmax.f32 %v2034_v39, %v2044_v41  ;;  %vm683_vm8 = vcmp.ge.f32.partialorder %v680_v44, 2.0  ;;  %v803_v39 = vld [vmem:[%s3390_s6 + $0x1e8] sm:$0xff]  ;;  %v852_v41 = vld [vmem:[%s3390_s6 + $0x370] sm:$0x3f]  ;;  %888 = vmatpush.msra.mxu0 %v778_v36  ;;  %v854_v36 = vld [vmem:[%s3390_s6 + $0x380] sm:$0x3f] }
  0xab   : > { %v600_v47 = vpop.f32.mrf.mxu2  ;;  %v2074_v63 = vsel %vm683_vm8, 1.0, %v2284_v38  ;;  %v791_v44 = vld [vmem:[%s3390_s6 + $0x188] sm:$0xff] }
  0xac   : > { %v620_v45 = vpop.f32.mrf.mxu3  ;;  %v571_v55 = vmax.f32 %v512_v43, %v2054_v50  ;;  %v601_v56 = vadd.f32 %v600_v47, %v2450_v27  ;;  %v797_v43 = vld [vmem:[%s3390_s6 + $0x1b8] sm:$0xff]  ;;  %889 = vmatpush.msra.mxu0 %v772_v42  ;;  %v755_v50 = vld [vmem:[%s3390_s6 + $0x68] sm:$0xff] }
  0xad   : > { %v621_v48 = vadd.f32 %v620_v45, %v2450_v27  ;;  %v541_v49 = vpop.f32.mrf.mxu0  ;;  %v785_v45 = vld [vmem:[%s3390_s6 + $0x158] sm:$0xff] }
  0xae   : > { %v542_v51 = vadd.f32 %v541_v49, %v2450_v27  ;;  %vm623_vm12 = vcmp.ge.f32.partialorder %v601_v56, 2.0  ;;  %v773_v47 = vld [vmem:[%s3390_s6 + $0xf8] sm:$0xff]  ;;  %v824_v56 = vld [vmem:[%s3390_s6 + $0x290] sm:$0xff] }
  0xaf   : > { %vm624_vm9 = vcmp.ge.f32.partialorder %v621_v48, 2.0  ;;  %v2063_v11 = vsel %vm623_vm12, 1.0, %v2284_v38  ;;  %v767_v48 = vld [vmem:[%s3390_s6 + $0xc8] sm:$0xff]  ;;  %v761_v49 = vld [vmem:[%s3390_s6 + $0x98] sm:$0xff]  ;;  %vm1379_vm12 = vcmask 244736  }
  0xb0   : > { %v2064_v57 = vsel %vm624_vm9, 1.0, %v2284_v38  ;;  %vm564_vm10 = vcmp.ge.f32.partialorder %v542_v51, 2.0  ;;  %v749_v51 = vld [vmem:[%s3390_s6 + $0x38] sm:$0xff] }
  0xb1   : > { %v630_v60 = vmax.f32 %v571_v55, %v2064_v57  ;;  %v2053_v61 = vsel %vm564_vm10, 1.0, %v2284_v38  ;;  %v830_v55 = vld [vmem:[%s3390_s6 + $0x2c0] sm:$0xff] }
  0xb2   : > { %v570_v4 = vmax.f32 %v511_v62, %v2053_v61  ;;  %v818_v57 = vld [vmem:[%s3390_s6 + $0x260] sm:$0xff] }
  0xb3   : > { %v689_v2 = vmax.f32 %v630_v60, %v2074_v63  ;;  %v800_v60 = vld [vmem:[%s3390_s6 + $0x1d0] sm:$0xff]  ;;  %v750_v61 = vld [vmem:[%s3390_s6 + $0x40] sm:$0xff] }
  0xb4   : > { %v629_v12 = vmax.f32 %v570_v4, %v2063_v11  ;;  %v846_v62 = vld [vmem:[%s3390_s6 + $0x340] sm:$0xff]  ;;  %v788_v4 = vld [vmem:[%s3390_s6 + $0x170] sm:$0xff] }
  0xb5   : > { %730 = vmatpush.msra.mxu3 %v689_v2  ;;  %v659_v7 = vpop.f32.mrf.mxu0  ;;  %v766_v63 = vld [vmem:[%s3390_s6 + $0xc0] sm:$0xff]  ;;  %v764_v11 = vld [vmem:[%s3390_s6 + $0xb0] sm:$0xff] }
  0xb6   : > { %v660_v8 = vadd.f32 %v659_v7, %v2450_v27  ;;  %2076 = vmatmul.msk.f32.vlgmr.msra.gmra.mxu3 %vm691_vm11, %v690_v3  ;;  %v774_v27 = vld [vmem:[%s3390_s6 + $0x100] sm:$0xff]  ;;  %890 = vmatpush.msra.mxu0 %v766_v63  ;;  %v748_v7 = vld [vmem:[%s3390_s6 + $0x30] sm:$0xff]  ;;  %v759_v63 = vld [vmem:[%s3390_s6 + $0x88] sm:$0xff] }
  0xb7   : > { %969 = vmatpush.msrb.mxu1 %v774_v27  ;;  %2083 = vmatpush.msk.msrb.mxu3 %vm860_vm2, %v851_v29  ;;  %v794_v2 = vld [vmem:[%s3390_s6 + $0x1a0] sm:$0xff]  ;;  %v1170_v27 = vpop.permute.xlu0 %1169  ;;  %v823_v29 = vld [vmem:[%s3390_s6 + $0x288] sm:$0xff] }
  0xb8   : > { %vm682_vm13 = vcmp.ge.f32.partialorder %v660_v8, 2.0  ;;  %v776_v8 = vld [vmem:[%s3390_s6 + $0x110] sm:$0xff]  ;;  %2154 = vpush %v1170_v27 }
  0xb9   : > { %v2073_v15 = vsel %vm682_vm13, 1.0, %v2284_v38  ;;  %970 = vmatpush.msrb.mxu1 %v768_v31  ;;  %953 = vmatpush.msrb.mxu3 %v845_v33  ;;  %v819_v33 = vld [vmem:[%s3390_s6 + $0x268] sm:$0xff] }
  0xba   : > { %v688_v16 = vmax.f32 %v629_v12, %v2073_v15  ;;  %v853_v12 = vld [vmem:[%s3390_s6 + $0x378] sm:$0x3f]  ;;  %v752_v15 = vld [vmem:[%s3390_s6 + $0x50] sm:$0xff] }
  0xbb   : > { %971 = vmatpush.msrb.mxu1 %v762_v35  ;;  %954 = vmatpush.msrb.mxu3 %v839_v37  ;;  %v813_v35 = vld [vmem:[%s3390_s6 + $0x238] sm:$0xff] }
  0xbc   : > { %710 = vmatpush.msra.mxu2 %v688_v16  ;;  %v841_v16 = vld [vmem:[%s3390_s6 + $0x318] sm:$0xff] }
  0xbd   : > { %2075 = vmatmul.msk.f32.vlgmr.msra.gmra.mxu2 %vm691_vm11, %v690_v3  ;;  %972 = vmatpush.msrb.mxu1 %v756_v40  ;;  %v760_v3 = vld [vmem:[%s3390_s6 + $0x90] sm:$0xff]  ;;  %v805_v37 = vld [vmem:[%s3390_s6 + $0x1f8] sm:$0xff]  ;;  %vm1366_vm11 = vcmask 1041408  }
  0xbe   : > { %919 = vmatpush.msrb.mxu2 %v833_v19  ;;  %2086 = vmatpush.msk.msra.mxu3 %vm860_vm2, %v852_v41  ;;  %v835_v19 = vld [vmem:[%s3390_s6 + $0x2e8] sm:$0xff]  ;;  %v848_v41 = vld [vmem:[%s3390_s6 + $0x350] sm:$0xff] }
  0xbf   : > { %973 = vmatpush.msrb.mxu1 %v750_v61  ;;  %891 = vmatpush.msra.mxu0 %v760_v3  ;;  %v765_v61 = vld [vmem:[%s3390_s6 + $0xb8] sm:$0xff]  ;;  %v747_v3 = vld [vmem:[%s3390_s6 + $0x28] sm:$0xff] }
  0xc0   : > { %920 = vmatpush.msrb.mxu2 %v827_v22  ;;  %993 = vmatpush.msra.mxu3 %v846_v62  ;;  %v829_v22 = vld [vmem:[%s3390_s6 + $0x2b8] sm:$0xff] }
  0xc1   : > { %974 = vmatpush.msrb.mxu1 %v744_v0  ;;  %892 = vmatpush.msra.mxu0 %v754_v5  ;;  %v757_v62 = vld [vmem:[%s3390_s6 + $0x78] sm:$0xff]  ;;  %v751_v0 = vld [vmem:[%s3390_s6 + $0x48] sm:$0xff]  ;;  %v2897_v5 = vld [vmem:[%s3391_s7 + $0x70] sm:$0xff] }
  0xc2   : > { %921 = vmatpush.msrb.mxu2 %v821_v26  ;;  %994 = vmatpush.msra.mxu3 %v840_v1  ;;  %v1179_v26 = vpop.permute.xlu1 %1178  ;;  %v753_v1 = vld [vmem:[%s3390_s6 + $0x58] sm:$0xff] }
  0xc3   : > { %893 = vmatpush.msra.mxu0 %v748_v7  ;;  %2156 = vpush %v1179_v26  ;;  %v2911_v7 = vld [vmem:[%s3391_s7 + $0x60] sm:$0xff] }
  0xc4   : > { %922 = vmatpush.msrb.mxu2 %v815_v30  ;;  %v825_v30 = vld [vmem:[%s3390_s6 + $0x298] sm:$0xff]  ;;  %2158 = vpush %v2490_v53  ;;  %v811_v53 = vld [vmem:[%s3390_s6 + $0x228] sm:$0xff]  ;;  %v2976_v26 = vld [vmem:[%s3391_s7 + $0x20] sm:$0xff] }
  0xc5   : > { %894 = vmatpush.msra.mxu0 %v742_v9 }
  0xc6   : > { %923 = vmatpush.msrb.mxu2 %v809_v34  ;;  %v2285_v34 = vmov 1.0  }
  0xc7   : > { %2089 = vmatpush.msk.msrb.mxu0 %vm860_vm2, %v853_v12 }
  0xc8   : > { %924 = vmatpush.msrb.mxu2 %v803_v39  ;;  %v807_v39 = vld [vmem:[%s3390_s6 + $0x208] sm:$0xff] }
  0xc9   : > { %1033 = vmatpush.msrb.mxu0 %v847_v14  ;;  %v2941_v14 = vld [vmem:[%s3391_s7 + $0x40] sm:$0xff] }
  0xca   : > { %925 = vmatpush.msrb.mxu2 %v797_v43  ;;  %v1196_v40 = vpop.permute.xlu1 %1195  ;;  %v799_v43 = vld [vmem:[%s3390_s6 + $0x1c8] sm:$0xff] }
  0xcb   : > { %1034 = vmatpush.msrb.mxu0 %v841_v16  ;;  %2160 = vpush %v1196_v40 }
  0xcc   : > { %926 = vmatpush.msrb.mxu2 %v791_v44  ;;  %v801_v44 = vld [vmem:[%s3390_s6 + $0x1d8] sm:$0xff]  ;;  %2162 = vpush %v1205_v28 }
  0xcd   : > { %2164 = vpush %v2559_v24  ;;  %v787_v24 = vld [vmem:[%s3390_s6 + $0x168] sm:$0xff]  ;;  %v2985_v28 = vld [vmem:[%s3391_s7 + $0x18] sm:$0xff] }
  0xce   : > { %927 = vmatpush.msrb.mxu2 %v785_v45 }
  0xd0   : > { %928 = vmatpush.msrb.mxu2 %v779_v46  ;;  %v793_v46 = vld [vmem:[%s3390_s6 + $0x198] sm:$0xff] }
  0xd2   : > { %929 = vmatpush.msrb.mxu2 %v773_v47  ;;  %v795_v47 = vld [vmem:[%s3390_s6 + $0x1a8] sm:$0xff] }
  0xd4   : > { %930 = vmatpush.msrb.mxu2 %v767_v48  ;;  %v842_v48 = vld [vmem:[%s3390_s6 + $0x320] sm:$0xff] }
  0xd6   : > { %931 = vmatpush.msrb.mxu2 %v761_v49  ;;  %v789_v49 = vld [vmem:[%s3390_s6 + $0x178] sm:$0xff] }
  0xd8   : > { %932 = vmatpush.msrb.mxu2 %v755_v50  ;;  %v855_v50 = vld [vmem:[%s3390_s6 + $0x388] sm:$0x3f] }
  0xda   : > { %933 = vmatpush.msrb.mxu2 %v749_v51  ;;  %v781_v51 = vld [vmem:[%s3390_s6 + $0x138] sm:$0xff] }
  0xdc   : > { %934 = vmatpush.msrb.mxu2 %v743_v52  ;;  %v783_v52 = vld [vmem:[%s3390_s6 + $0x148] sm:$0xff] }
  0xde   : > { %1039 = vmatpush.msra.mxu2 %v836_v54  ;;  %v849_v54 = vld [vmem:[%s3390_s6 + $0x358] sm:$0xff] }
  0xe0   : > { %1040 = vmatpush.msra.mxu2 %v830_v55  ;;  %v775_v55 = vld [vmem:[%s3390_s6 + $0x108] sm:$0xff] }
  0xe2   : > { %1041 = vmatpush.msra.mxu2 %v824_v56  ;;  %v777_v56 = vld [vmem:[%s3390_s6 + $0x118] sm:$0xff] }
  0xe4   : > { %1042 = vmatpush.msra.mxu2 %v818_v57  ;;  %v769_v57 = vld [vmem:[%s3390_s6 + $0xd8] sm:$0xff] }
  0xe6   : > { %1043 = vmatpush.msra.mxu2 %v812_v58  ;;  %v771_v58 = vld [vmem:[%s3390_s6 + $0xe8] sm:$0xff] }
  0xe8   : > { %1044 = vmatpush.msra.mxu2 %v806_v59  ;;  %v843_v59 = vld [vmem:[%s3390_s6 + $0x328] sm:$0xff] }
  0xe9   : > { %s2987_s14 = spop %2154 }
  0xea   : > { %1045 = vmatpush.msra.mxu2 %v800_v60  ;;  %v763_v60 = vld [vmem:[%s3390_s6 + $0xa8] sm:$0xff] }
  0xec   : > { %1046 = vmatpush.msra.mxu2 %v794_v2  ;;  %v745_v2 = vld [vmem:[%s3390_s6 + $0x18] sm:$0xff] }
  0xee   : > { %1047 = vmatpush.msra.mxu2 %v788_v4  ;;  %v2890_v4 = vld [vmem:[%s3391_s7 + $0x78] sm:$0xff] }
  0xf0   : > { %1048 = vmatpush.msra.mxu2 %v782_v6  ;;  %v2904_v6 = vld [vmem:[%s3391_s7 + $0x68] sm:$0xff] }
  0xf2   : > { %1049 = vmatpush.msra.mxu2 %v776_v8  ;;  %v2918_v8 = vld [vmem:[%s3391_s7 + $0x58] sm:$0xff] }
  0xf4   : > { %1050 = vmatpush.msra.mxu2 %v770_v10  ;;  %v2925_v10 = vld [vmem:[%s3391_s7 + $0x50] sm:$0xff]  ;;  %s2998_s18 = spop %2156 }
  0xf5   : > { %s3009_s26 = spop %2158 }
  0xf6   : > { %1051 = vmatpush.msra.mxu2 %v764_v11 }
  0xf8   : > { %1052 = vmatpush.msra.mxu2 %v758_v13  ;;  %v2934_v13 = vld [vmem:[%s3391_s7 + $0x48] sm:$0xff] }
  0xfa   : > { %1053 = vmatpush.msra.mxu2 %v752_v15  ;;  %v1222_v42 = vpop.permute.xlu2 %1221  ;;  %v2948_v15 = vld [vmem:[%s3391_s7 + $0x38] sm:$0xff] }
  0xfb   : > { %2166 = vpush %v1222_v42 }
  0xfc   : > { %1054 = vmatpush.msra.mxu2 %v746_v17  ;;  %s3023_s12 = spop %2160 }
  0xfd   : > { %s3030_s15 = spop %2162 }
  0xfe   : > { %s3038_s17 = spop %2164 }
 0x112   : > { %v1231_v45 = vpop.permute.xlu0 %1230 }
 0x113   : > { %2168 = vpush %v1231_v45 }
 0x12c   : > { %s3046_s23 = spop %2166 }
 0x139   : > { %v732_v18 = vpop.f32.mrf.mxu3 }
 0x13a   : > { %vm736_vm15 = vcmp.ge.f32.partialorder %v732_v18, 0.5  ;;  %v2957_v18 = vld [vmem:[%s3391_s7 + $0x30] sm:$0xff] }
 0x13b   : > { %v2740_v21 = vsel %vm736_vm15, 1.0, %v2284_v38 }
 0x13c   : > { %2081 = vmatmul.msk.f32.vlgmr.msra.gmra.mxu1 %vm856_vm14, %v2740_v21  ;;  %2084 = vmatmul.msk.f32.vlgmr.msrb.gmra.mxu3 %vm856_vm14, %v2740_v21 }
 0x13d   : > { %999 = vmatpush.msrb.mxu3 %v835_v19  ;;  %1079 = vmatpush.msra.mxu1 %v837_v20 }
 0x13f   : > { %1000 = vmatpush.msrb.mxu3 %v829_v22  ;;  %1080 = vmatpush.msra.mxu1 %v831_v23  ;;  %v2968_v23 = vld [vmem:[%s3391_s7 + $0x28] sm:$0xff] }
 0x140   : > { %v2759_v31 = vpop.f32.mrf.mxu2 }
 0x141   : > { %1001 = vmatpush.msrb.mxu3 %v823_v29  ;;  %1081 = vmatpush.msra.mxu1 %v825_v30  ;;  %vm735_vm0 = vcmp.ge.f32.partialorder %v2759_v31, 0.5  ;;  %v1172_v29 = vstv %s2987_s14  ;;  %v2996_v31 = vld [vmem:[%s3391_s7 + $0x10] sm:$0xff]  ;;  %s1965_s14 = scalar_lea.hbm %s3395_s11, %s2370_s5 }
 0x142   : > { %2079 = vmatmul.msk.f32.vlgmr.msra.gmra.mxu0 %vm735_vm0, %v2285_v34  ;;  %2082 = vmatmul.msk.f32.vlgmr.msrb.gmra.mxu2 %vm735_vm0, %v2285_v34 }
 0x143   : > { %1002 = vmatpush.msrb.mxu3 %v817_v32  ;;  %1082 = vmatpush.msra.mxu1 %v819_v33 }
 0x144   : > { %2087 = vmatmul.msk.f32.vlgmr.msra.gmra.mxu3 %vm856_vm14, %v2740_v21  ;;  %2085 = vmatmul.msk.f32.vlgmr.msrb.gmra.mxu1 %vm735_vm0, %v2285_v34  ;;  %s3055_s25 = spop %2168 }
 0x145   : > { %1003 = vmatpush.msrb.mxu3 %v811_v53  ;;  %1083 = vmatpush.msra.mxu1 %v813_v35  ;;  %v1165_v53 = vstv %s2978_s16 }
 0x146   : > { %2092 = vmatpush.msk.msra.mxu0 %vm860_vm2, %v854_v36  ;;  %v3007_v36 = vld [vmem:[%s3391_s7 + $0x8] sm:$0xff] }
 0x147   : > { %1004 = vmatpush.msrb.mxu3 %v805_v37  ;;  %1084 = vmatpush.msra.mxu1 %v807_v39  ;;  %v1181_v39 = vstv %s2998_s18  ;;  %s380_s18 = scalar_lea.vmem [#allocation3], %s379_s0 }
 0x148   : > { %1073 = vmatpush.msra.mxu0 %v848_v41  ;;  %v3019_v41 = vld [vmem:[%s3391_s7] sm:$0xff] }
 0x149   : > { %1005 = vmatpush.msrb.mxu3 %v799_v43  ;;  %1085 = vmatpush.msra.mxu1 %v801_v44  ;;  %v1189_v43 = vstv %s3009_s26  ;;  %s1967_s26 = sshll.u32 %s380_s18, 4  ;;  %s1968_s26 = int_to_ptr.vmem [resolvable:$true] %s1967_s26 }
 0x14a   : > { %2090 = vmatmul.msk.f32.vlgmr.msrb.gmra.mxu0 %vm856_vm14, %v2740_v21  ;;  %2091 = vmatmul.msk.f32.vlgmr.msra.gmra.mxu2 %vm735_vm0, %v2285_v34 }
 0x14b   : > { %1006 = vmatpush.msrb.mxu3 %v793_v46  ;;  %1086 = vmatpush.msra.mxu1 %v795_v47  ;;  %v1198_v47 = vstv %s3023_s12  ;;  %s1969_s12 = sshll.u32 %s1965_s14, 4  ;;  %s1970_s12 = int_to_ptr.hbm [resolvable:$true] %s1969_s12 }
 0x14c   : > { %1074 = vmatpush.msra.mxu0 %v842_v48 }
 0x14d   : > { %1007 = vmatpush.msrb.mxu3 %v787_v24  ;;  %1087 = vmatpush.msra.mxu1 %v789_v49 }
 0x14e   : > { %2095 = vmatpush.msk.msrb.mxu0 %vm860_vm2, %v855_v50  ;;  %v1207_v50 = vstv %s3030_s15  ;;  %s1957_s15 = scalar_lea.sflag [#allocation4], %s379_s0 }
 0x14f   : > { %1008 = vmatpush.msrb.mxu3 %v781_v51  ;;  %1088 = vmatpush.msra.mxu1 %v783_v52 }
 0x150   : > { %1113 = vmatpush.msrb.mxu0 %v849_v54 }
 0x151   : > { %1009 = vmatpush.msrb.mxu3 %v775_v55  ;;  %1089 = vmatpush.msra.mxu1 %v777_v56 }
 0x152   : > { %2093 = vmatmul.msk.f32.vlgmr.msra.gmra.mxu0 %vm856_vm14, %v2740_v21 }
 0x153   : > { %1010 = vmatpush.msrb.mxu3 %v769_v57  ;;  %1090 = vmatpush.msra.mxu1 %v771_v58  ;;  %v1215_v58 = vstv %s3038_s17  ;;  %s2231_s17 = sshra.s32 %s1970_s12, 4  ;;  %s2232_s17 = int_to_ptr.hbm [resolvable:$true] %s2231_s17 }
 0x154   : > { %1114 = vmatpush.msrb.mxu0 %v843_v59  ;;  %p2238_p0 = scmp.lt.s32.totalorder %s2232_s17, %s3395_s11 }
 0x155   : > { %1011 = vmatpush.msrb.mxu3 %v763_v60  ;;  %1091 = vmatpush.msra.mxu1 %v765_v61 }
 0x157   : > { %1012 = vmatpush.msrb.mxu3 %v757_v62  ;;  %1092 = vmatpush.msra.mxu1 %v759_v63 }
 0x159   : > { %1013 = vmatpush.msrb.mxu3 %v751_v0  ;;  %1093 = vmatpush.msra.mxu1 %v753_v1  ;;  %v1224_v0 = vstv %s3046_s23  ;;  %s2233_s23 = scalar_lea.hbm %s2232_s17, 1 }
 0x15a   : > { %2096 = vmatmul.msk.f32.vlgmr.msrb.gmra.mxu0 %vm856_vm14, %v2740_v21  ;;  %p2234_p11 = scmp.ne.s32.totalorder %s2232_s17, %s2233_s23  ;;  %p2239_p1 = scmp.lt.s32.totalorder %s2237_s13, %s2233_s23 }
 0x15b   : > { %1014 = vmatpush.msrb.mxu3 %v745_v2  ;;  %1094 = vmatpush.msra.mxu1 %v747_v3 }
 0x15c   : > { %2088 = vmatmul.msk.f32.vlgmr.msrb.gmra.mxu3 %vm735_vm0, %v2285_v34  ;;  %2094 = vmatmul.msk.f32.vlgmr.msra.gmra.mxu1 %vm735_vm0, %v2285_v34  ;;  %p2235_p12 = pnand %p2234_p11, %p2387_p5  ;;  %p2240_p2 = por %p2239_p1, %p2238_p0 }
 0x15d   : > { %1316 = vmatpush.msra.mxu3 %v2890_v4  ;;  %1504 = vmatpush.msrb.mxu1 %v2890_v4 }
 0x15e   : > { %p2236_p13 = pneg %p2235_p12 }
 0x15f   : > { %1317 = vmatpush.msra.mxu3 %v2897_v5  ;;  %1505 = vmatpush.msrb.mxu1 %v2897_v5 }
 0x160   : > { %p2241_p3 = pnand %p2240_p2, %p2236_p13 }
 0x161   : > { %1318 = vmatpush.msra.mxu3 %v2904_v6  ;;  %1506 = vmatpush.msrb.mxu1 %v2904_v6 }
 0x163   : > { %1319 = vmatpush.msra.mxu3 %v2911_v7  ;;  %1507 = vmatpush.msrb.mxu1 %v2911_v7 }
 0x165   : > { %1320 = vmatpush.msra.mxu3 %v2918_v8  ;;  %1508 = vmatpush.msrb.mxu1 %v2918_v8 }
 0x167   : > { %1321 = vmatpush.msra.mxu3 %v2925_v10  ;;  %1509 = vmatpush.msrb.mxu1 %v2925_v10 }
 0x169   : > { %1322 = vmatpush.msra.mxu3 %v2934_v13  ;;  %1510 = vmatpush.msrb.mxu1 %v2934_v13 }
 0x16b   : > { %1323 = vmatpush.msra.mxu3 %v2941_v14  ;;  %1511 = vmatpush.msrb.mxu1 %v2941_v14 }
 0x16d   : > { %1324 = vmatpush.msra.mxu3 %v2948_v15  ;;  %1512 = vmatpush.msrb.mxu1 %v2948_v15 }
 0x16f   : > { %1325 = vmatpush.msra.mxu3 %v2957_v18  ;;  %1513 = vmatpush.msrb.mxu1 %v2957_v18 }
 0x171   : > { %1326 = vmatpush.msra.mxu3 %v2968_v23  ;;  %1514 = vmatpush.msrb.mxu1 %v2968_v23 }
 0x173   : > { %1327 = vmatpush.msra.mxu3 %v2976_v26  ;;  %1515 = vmatpush.msrb.mxu1 %v2976_v26 }
 0x175   : > { %1328 = vmatpush.msra.mxu3 %v2985_v28  ;;  %1516 = vmatpush.msrb.mxu1 %v2985_v28 }
 0x177   : > { %1329 = vmatpush.msra.mxu3 %v2996_v31  ;;  %1517 = vmatpush.msrb.mxu1 %v2996_v31 }
 0x179   : > { %1330 = vmatpush.msra.mxu3 %v3007_v36  ;;  %1518 = vmatpush.msrb.mxu1 %v3007_v36 }
 0x17b   : > { %1331 = vmatpush.msra.mxu3 %v3019_v41  ;;  %1519 = vmatpush.msrb.mxu1 %v3019_v41 }
 0x17d   : > { %1828 = vmatpush.msra.mxu1 %v2890_v4 }
 0x17f   : > { %1829 = vmatpush.msra.mxu1 %v2897_v5 }
 0x181   : > { %1830 = vmatpush.msra.mxu1 %v2904_v6 }
 0x183   : > { %1831 = vmatpush.msra.mxu1 %v2911_v7 }
 0x185   : > { %1832 = vmatpush.msra.mxu1 %v2918_v8 }
 0x187   : > { %1833 = vmatpush.msra.mxu1 %v2925_v10 }
 0x189   : > { %1834 = vmatpush.msra.mxu1 %v2934_v13 }
 0x18b   : > { %1835 = vmatpush.msra.mxu1 %v2941_v14 }
 0x18d   : > { %1836 = vmatpush.msra.mxu1 %v2948_v15 }
 0x18f   : > { %1837 = vmatpush.msra.mxu1 %v2957_v18 }
 0x191   : > { %1838 = vmatpush.msra.mxu1 %v2968_v23 }
 0x193   : > { %1839 = vmatpush.msra.mxu1 %v2976_v26 }
 0x195   : > { %1840 = vmatpush.msra.mxu1 %v2985_v28 }
 0x197   : > { %1841 = vmatpush.msra.mxu1 %v2996_v31 }
 0x199   : > { %1842 = vmatpush.msra.mxu1 %v3007_v36 }
 0x19b   : > { %1843 = vmatpush.msra.mxu1 %v3019_v41 }
 0x1b9   : > { %v916_v9 = vpop.f32.mrf.mxu1 }
 0x1bf   : > { %v2927_v11 = vpop.f32.mrf.mxu3  ;;  %v896_v12 = vpop.f32.mrf.mxu0 }
 0x1c0   : > { %v917_v21 = vadd.f32 %v916_v9, %v896_v12  ;;  %v1233_v12 = vstv %s3055_s25 }
 0x1c1   : > { %v976_v17 = vpop.f32.mrf.mxu1 }
 0x1c2   : > { %v1125_v27 = vrot.slane %v917_v21, 7  ;;  %v1144_v48 = vrot.slane %v917_v21, 1  ;;  %v1191_v24 = vmul.f32 %v1189_v43, %v917_v21 }
 0x1c4   : > { %v1138_v34 = vsel %vm1137_vm1, 0.0, %v1125_v27  ;;  %v1157_v57 = vsel %vm1156_vm3, %v1144_v48, 0.0  ;;  %v3081_v27 = vld [vmem:[%s3391_s7 + $0x88] sm:$0xff] }
 0x1c5   : > { %v2950_v16 = vpop.f32.mrf.mxu2  ;;  %v1167_v42 = vmul.f32 %v1165_v53, %v1138_v34  ;;  %v1217_v2 = vmul.f32 %v1215_v58, %v1157_v57 }
 0x1c6   : > { %v957_v59 = vadd.f32 %v2927_v11, %v2950_v16  ;;  %v3069_v16 = vld [vmem:[%s3391_s7 + $0x90] sm:$0x3f] }
 0x1c7   : > { %v996_v19 = vpop.f32.mrf.mxu3  ;;  %v2959_v20 = vpop.f32.mrf.mxu0  ;;  %2099 = vmatpush.msk.msra.mxu0 %vm860_vm2, %v3069_v16 }
 0x1c8   : > { %v2963_v22 = vadd.f32 %v996_v19, %v976_v17  ;;  %v1126_v9 = vrot.slane %v957_v59, 7 }
 0x1c9   : > { %1350 = vmatpush.msra.mxu0 %v3081_v27 }
 0x1ca   : > { %v1127_v25 = vrot.slane %v2963_v22, 7  ;;  %v1146_v51 = vrot.slane %v2963_v22, 1  ;;  %v1200_v52 = vmul.f32 %v1198_v47, %v2963_v22 }
 0x1cc   : > { %v1140_v30 = vsel %vm1137_vm1, 0.0, %v1127_v25  ;;  %v1159_v63 = vsel %vm1156_vm3, %v1146_v51, 0.0  ;;  %v1145_v51 = vrot.slane %v957_v59, 1 }
 0x1cd   : > { %v1056_v32 = vpop.f32.mrf.mxu2  ;;  %v1174_v37 = vmul.f32 %v1172_v29, %v1140_v30  ;;  %v1226_v17 = vmul.f32 %v1224_v0, %v1159_v63 }
 0x1cf   : > { %v1076_v33 = vpop.f32.mrf.mxu0  ;;  %v1176_v45 = vadd.f32 %v1174_v37, %v1167_v42 }
 0x1d0   : > { %v1077_v35 = vadd.f32 %v1076_v33, %v1056_v32  ;;  %v1139_v33 = vsel %vm1137_vm1, 0.0, %v1126_v9 }
 0x1d2   : > { %v1129_v40 = vrot.slane %v1077_v35, 7  ;;  %v1148_v60 = vrot.slane %v1077_v35, 1  ;;  %v1209_v62 = vmul.f32 %v1207_v50, %v1077_v35  ;;  %v1244_v35 = vpop.permute.xlu1 %1243 }
 0x1d4   : > { %v1142_v44 = vsel %vm1137_vm1, 0.0, %v1129_v40  ;;  %v1161_v11 = vsel %vm1156_vm3, %v1148_v60, 0.0  ;;  %v1158_v60 = vsel %vm1156_vm3, %v1145_v51, 0.0 }
 0x1d5   : > { %v1183_v46 = vmul.f32 %v1181_v39, %v1142_v44  ;;  %v1235_v30 = vmul.f32 %v1233_v12, %v1161_v11  ;;  %v1168_v44 = vmul.f32 %v1165_v53, %v1139_v33 }
 0x1d7   : > { %v1185_v49 = vadd.f32 %v1183_v46, %v1176_v45  ;;  %v1116_v56 = vpop.f32.mrf.mxu0 }
 0x1d9   : > { %v1193_v54 = vadd.f32 %v1191_v24, %v1185_v49  ;;  %v1096_v55 = vpop.f32.mrf.mxu1 }
 0x1da   : > { %v3059_v1 = vadd.f32 %v1116_v56, %v1096_v55 }
 0x1db   : > { %v1202_v61 = vadd.f32 %v1200_v52, %v1193_v54  ;;  %v1192_v52 = vmul.f32 %v1189_v43, %v957_v59 }
 0x1dc   : > { %v1130_v22 = vrot.slane %v3059_v1, 7  ;;  %v1210_v43 = vmul.f32 %v1207_v50, %v3059_v1 }
 0x1dd   : > { %v1211_v3 = vadd.f32 %v1209_v62, %v1202_v61  ;;  %v1149_v61 = vrot.slane %v3059_v1, 1 }
 0x1de   : > { %v1143_v40 = vsel %vm1137_vm1, 0.0, %v1130_v22 }
 0x1df   : > { %v1016_v19 = vpop.f32.mrf.mxu3  ;;  %v1219_v21 = vadd.f32 %v1217_v2, %v1211_v3  ;;  %v1184_v48 = vmul.f32 %v1181_v39, %v1143_v40 }
 0x1e0   : > { %v1037_v25 = vadd.f32 %v2959_v20, %v1016_v19  ;;  %v3091_v20 = vld [vmem:[%s3391_s7 + $0x80] sm:$0xff] }
 0x1e1   : > { %v1228_v32 = vadd.f32 %v1226_v17, %v1219_v21  ;;  %1351 = vmatpush.msra.mxu0 %v3091_v20  ;;  %v1162_v17 = vsel %vm1156_vm3, %v1149_v61, 0.0 }
 0x1e2   : > { %v1128_v34 = vrot.slane %v1037_v25, 7  ;;  %v1147_v53 = vrot.slane %v1037_v25, 1  ;;  %v1201_v39 = vmul.f32 %v1198_v47, %v1037_v25  ;;  %v1218_v47 = vmul.f32 %v1215_v58, %v1158_v60 }
 0x1e3   : > { %v1237_v37 = vadd.f32 %v1235_v30, %v1228_v32  ;;  %v1236_v58 = vmul.f32 %v1233_v12, %v1162_v17 }
 0x1e4   : > { %v1141_v42 = vsel %vm1137_vm1, 0.0, %v1128_v34  ;;  %v1160_v2 = vsel %vm1156_vm3, %v1147_v53, 0.0 }
 0x1e5   : > { %v1175_v45 = vmul.f32 %v1172_v29, %v1141_v42  ;;  %v3102_v46 = vadd.f32 %v1244_v35, %v1237_v37  ;;  %v1227_v50 = vmul.f32 %v1224_v0, %v1160_v2 }
 0x1e7   : > { %v1177_v24 = vadd.f32 %v1175_v45, %v1168_v44  ;;  %v1280_v49 = vmul.f32 0.5, %v3102_v46 }
 0x1e9   : > { %v1186_v54 = vadd.f32 %v1184_v48, %v1177_v24  ;;  %vm1284_vm4 = vcmp.ge.f32.partialorder %v1280_v49, 1.0 }
 0x1ea   : > { %v2097_v29 = vsel %vm1284_vm4, 1.0, %v2284_v38 }
 0x1eb   : > { %v1194_v55 = vadd.f32 %v1192_v52, %v1186_v54  ;;  %v1290_v56 = vsub.f32 1.0, %v2097_v29  ;;  %v1296_v57 = vrot.slane %v2097_v29, 1 }
 0x1ed   : > { %v1203_v59 = vadd.f32 %v1201_v39, %v1194_v55  ;;  %v1292_v62 = vmul.f32 %v1290_v56, %v1280_v49  ;;  %v1300_v63 = vadd.f32 %v2097_v29, %v1296_v57 }
 0x1ef   : > { %v1212_v3 = vadd.f32 %v1210_v43, %v1203_v59  ;;  %v1469_v9 = vsub.f32 %v3102_v46, %v1292_v62  ;;  %v1304_v11 = vrot.slane %v1300_v63, 1 }
 0x1f1   : > { %v1220_v19 = vadd.f32 %v1218_v47, %v1212_v3  ;;  %v1471_v1 = vmul.f32 0.5, %v1469_v9  ;;  %v1308_v21 = vsel %vm1137_vm1, %v1300_v63, %v1304_v11 }
 0x1f2   : > { %1332 = vmatmul.f32.vlgmr.msra.gmra.mxu3 %v1308_v21 }
 0x1f3   : > { %v1229_v22 = vadd.f32 %v1227_v50, %v1220_v19  ;;  %v1473_v25 = vadd.f32 %v1471_v1, %v1292_v62 }
 0x1f5   : > { %v1238_v30 = vadd.f32 %v1236_v58, %v1229_v22  ;;  %vm1475_vm5 = vcmp.ge.f32.partialorder %v1473_v25, 1.0 }
 0x1f6   : > { %v2110_v32 = vsel %vm1475_vm5, 1.0, %v2284_v38 }
 0x1f7   : > { %v1247_v33 = vadd.f32 %v1244_v35, %v1238_v30  ;;  %v1481_v34 = vsub.f32 1.0, %v2110_v32  ;;  %v1487_v37 = vrot.slane %v2110_v32, 1 }
 0x1f9   : > { %v1281_v40 = vmul.f32 0.5, %v1247_v33  ;;  %v1483_v42 = vmul.f32 %v1481_v34, %v1473_v25  ;;  %v1491_v0 = vadd.f32 %v2110_v32, %v1487_v37  ;;  %v3160_v34 = vld [vmem:[%s3392_s8 + $0x18] sm:$0xff]  ;;  %v1254_v37 = vld [vmem:[%s3392_s8 + $0x30] sm:$0xff] }
 0x1fa   : > { %2104 = vmatpush.msk.msrb.mxu2 %vm860_vm2, %v3160_v34 }
 0x1fb   : > { %vm1285_vm6 = vcmp.ge.f32.partialorder %v1281_v40, 1.0  ;;  %v1633_v44 = vsub.f32 %v3102_v46, %v1483_v42  ;;  %v1495_v45 = vrot.slane %v1491_v0, 1 }
 0x1fc   : > { %v2098_v48 = vsel %vm1285_vm6, 1.0, %v2284_v38 }
 0x1fd   : > { %v1291_v24 = vsub.f32 1.0, %v2098_v48  ;;  %v1635_v49 = vmul.f32 0.5, %v1633_v44  ;;  %v1499_v12 = vsel %vm1137_vm1, %v1491_v0, %v1495_v45  ;;  %v1297_v51 = vrot.slane %v2098_v48, 1  ;;  %v1253_v0 = vld [vmem:[%s3392_s8 + $0x28] sm:$0xff]  ;;  %v3179_v45 = vld [vmem:[%s3392_s8 + $0x10] sm:$0xff] }
 0x1fe   : > { %1520 = vmatmul.f32.vlgmr.msrb.gmra.mxu1 %v1499_v12  ;;  %1421 = vmatpush.msrb.mxu2 %v3179_v45  ;;  %v3193_v12 = vld [vmem:[%s3392_s8 + $0x8] sm:$0xff] }
 0x1ff   : > { %v1293_v52 = vmul.f32 %v1291_v24, %v1281_v40  ;;  %v1637_v54 = vadd.f32 %v1635_v49, %v1483_v42  ;;  %v1301_v35 = vadd.f32 %v2098_v48, %v1297_v51  ;;  %v1255_v40 = vld [vmem:[%s3392_s8 + $0x38] sm:$0xf]  ;;  %v1370_v48 = vrot.slane %v1253_v0, 6  ;;  %v1252_v24 = vld [vmem:[%s3392_s8 + $0x20] sm:$0xff] }
 0x200   : > { %v1374_v42 = vrot.slane %v1255_v40, 6  ;;  %v1368_v51 = vrot.slane %v1252_v24, 6  ;;  %1422 = vmatpush.msrb.mxu2 %v3193_v12 }
 0x201   : > { %v1470_v53 = vsub.f32 %v1247_v33, %v1293_v52  ;;  %vm1639_vm7 = vcmp.ge.f32.partialorder %v1637_v54, 1.0  ;;  %v1305_v29 = vrot.slane %v1301_v35, 1 }
 0x202   : > { %v3139_v55 = vsel %vm1639_vm7, 1.0, %v2284_v38 }
 0x203   : > { %v1472_v39 = vmul.f32 0.5, %v1470_v53  ;;  %v1645_v56 = vsub.f32 1.0, %v3139_v55  ;;  %v1309_v57 = vsel %vm1137_vm1, %v1301_v35, %v1305_v29  ;;  %v1367_v35 = vrot.slane %v3160_v34, 6  ;;  %v3219_v29 = vld [vmem:[%s3393_s9 + $0x18] sm:$0x3f] }
 0x204   : > { %2100 = vmatmul.msk.f32.vlgmr.msra.gmra.mxu0 %vm856_vm14, %v1309_v57  ;;  %2120 = vmatpush.msk.msrb.mxu3 %vm860_vm2, %v3219_v29 }
 0x205   : > { %v1474_v60 = vadd.f32 %v1472_v39, %v1293_v52  ;;  %v1647_v61 = vmul.f32 %v1645_v56, %v1637_v54  ;;  %v3198_v52 = vsel %vm1366_vm11, %v1368_v51, %v1370_v48  ;;  %v3203_v54 = vld [vmem:[%s3392_s8] sm:$0xff]  ;;  %v3209_v53 = vsel %vm1366_vm11, %v1367_v35, %v1368_v51  ;;  %v3224_v39 = vld [vmem:[%s3393_s9 + $0x10] sm:$0xff] }
 0x206   : > { %1423 = vmatpush.msrb.mxu2 %v3203_v54  ;;  %1617 = vmatpush.msrb.mxu3 %v3224_v39 }
 0x207   : > { %vm1476_vm8 = vcmp.ge.f32.partialorder %v1474_v60, 1.0  ;;  %v1797_v43 = vsub.f32 %v3102_v46, %v1647_v61 }
 0x208   : > { %v3146_v59 = vsel %vm1476_vm8, 1.0, %v2284_v38  ;;  %2112 = vmatpush.msk.msra.mxu2 %vm860_vm2, %v3069_v16 }
 0x209   : > { %v1482_v62 = vsub.f32 1.0, %v3146_v59  ;;  %v1799_v63 = vmul.f32 0.5, %v1797_v43 }
 0x20a   : > { %1538 = vmatpush.msra.mxu2 %v3081_v27 }
 0x20b   : > { %v1484_v2 = vmul.f32 %v1482_v62, %v1474_v60  ;;  %v1801_v47 = vadd.f32 %v1799_v63, %v1647_v61  ;;  %v1488_v60 = vrot.slane %v3146_v59, 1 }
 0x20c   : > { %1539 = vmatpush.msra.mxu2 %v3091_v20 }
 0x20d   : > { %v1634_v3 = vsub.f32 %v1247_v33, %v1484_v2  ;;  %vm1803_vm9 = vcmp.ge.f32.partialorder %v1801_v47, 1.0  ;;  %v1492_v62 = vadd.f32 %v3146_v59, %v1488_v60  ;;  %v3251_v59 = vld [vmem:[%s3393_s9 + $0x8] sm:$0xff] }
 0x20e   : > { %v2136_v9 = vsel %vm1803_vm9, 1.0, %v2284_v38  ;;  %1618 = vmatpush.msrb.mxu3 %v3251_v59 }
 0x20f   : > { %v1636_v11 = vmul.f32 0.5, %v1634_v3  ;;  %v1811_v17 = vrot.slane %v2136_v9, 1  ;;  %v3256_v3 = vld [vmem:[%s3393_s9] sm:$0xff] }
 0x210   : > { %1619 = vmatpush.msrb.mxu3 %v3256_v3 }
 0x211   : > { %v1638_v19 = vadd.f32 %v1636_v11, %v1484_v2  ;;  %v1815_v50 = vadd.f32 %v2136_v9, %v1811_v17  ;;  %v1496_v2 = vrot.slane %v1492_v62, 1 }
 0x213   : > { %vm1640_vm10 = vcmp.ge.f32.partialorder %v1638_v19, 1.0  ;;  %v1819_v1 = vrot.slane %v1815_v50, 1  ;;  %v1500_v47 = vsel %vm1137_vm1, %v1492_v62, %v1496_v2 }
 0x214   : > { %v3151_v46 = vsel %vm1640_vm10, 1.0, %v2284_v38  ;;  %vm1954_vm10 = vcmask 8192  }
 0x215   : > { %v1646_v21 = vsub.f32 1.0, %v3151_v46  ;;  %v1823_v22 = vsel %vm1137_vm1, %v1815_v50, %v1819_v1 }
 0x216   : > { %1844 = vmatmul.f32.vlgmr.msra.gmra.mxu1 %v1823_v22 }
 0x217   : > { %v1648_v58 = vmul.f32 %v1646_v21, %v1638_v19 }
 0x219   : > { %v1798_v25 = vsub.f32 %v1247_v33, %v1648_v58  ;;  %v1372_v33 = vrot.slane %v1254_v37, 6 }
 0x21b   : > { %v1800_v30 = vmul.f32 0.5, %v1798_v25  ;;  %v3174_v44 = vsel %vm1366_vm11, %v1372_v33, %v1374_v42  ;;  %v3188_v49 = vsel %vm1366_vm11, %v1370_v48, %v1372_v33 }
 0x21c   : > { %2102 = vmatpush.msk.msrb.mxu0 %vm860_vm2, %v3174_v44  ;;  %2128 = vmatpush.msk.msra.mxu3 %vm860_vm2, %v3174_v44 }
 0x21d   : > { %v3155_v32 = vadd.f32 %v1800_v30, %v1648_v58  ;;  %v1652_v58 = vrot.slane %v3151_v46, 1 }
 0x21e   : > { %1397 = vmatpush.msrb.mxu0 %v3188_v49  ;;  %1728 = vmatpush.msra.mxu3 %v3188_v49 }
 0x21f   : > { %v1656_v40 = vadd.f32 %v3151_v46, %v1652_v58  ;;  %vm1804_vm4 = vcmp.ge.f32.partialorder %v3155_v32, 1.0 }
 0x220   : > { %1398 = vmatpush.msrb.mxu0 %v3198_v52  ;;  %1729 = vmatpush.msra.mxu3 %v3198_v52 }
 0x222   : > { %1399 = vmatpush.msrb.mxu0 %v3209_v53  ;;  %1730 = vmatpush.msra.mxu3 %v3209_v53 }
 0x224   : > { %2107 = vmatpush.msk.msra.mxu0 %vm860_vm2, %v3219_v29 }
 0x226   : > { %1454 = vmatpush.msra.mxu0 %v3224_v39 }
 0x228   : > { %1455 = vmatpush.msra.mxu0 %v3251_v59 }
 0x22a   : > { %1456 = vmatpush.msra.mxu0 %v3256_v3 }
 0x275   : > { %v1333_v56 = vpop.f32.mrf.mxu3 }
 0x27b   : > { %v1521_v21 = vpop.f32.mrf.mxu1 }
 0x281   : > { %v1353_v57 = vpop.f32.mrf.mxu0 }
 0x282   : > { %v1354_v61 = vadd.f32 %v1353_v57, %v1333_v56 }
 0x284   : > { %vm1356_vm13 = vcmp.ge.f32.partialorder %v1354_v61, 0.5 }
 0x285   : > { %v2101_v43 = vsel %vm1356_vm13, 1.0, %v2284_v38 }
 0x286   : > { %v1360_v63 = vrot.slane %v2101_v43, 1  ;;  %2105 = vmatmul.msk.f32.vlgmr.msrb.gmra.mxu2 %vm1379_vm12, %v2101_v43 }
 0x287   : > { %2117 = vmatpush.msk.msrb.mxu2 %vm860_vm2, %v3160_v34 }
 0x288   : > { %2103 = vmatmul.msk.f32.vlgmr.msrb.gmra.mxu0 %vm1379_vm12, %v1360_v63 }
 0x289   : > { %1586 = vmatpush.msrb.mxu2 %v3179_v45  ;;  %2115 = vmatpush.msk.msrb.mxu0 %vm860_vm2, %v3174_v44 }
 0x28b   : > { %1587 = vmatpush.msrb.mxu2 %v3193_v12  ;;  %1564 = vmatpush.msrb.mxu0 %v3188_v49 }
 0x28d   : > { %1588 = vmatpush.msrb.mxu2 %v3203_v54  ;;  %1565 = vmatpush.msrb.mxu0 %v3198_v52 }
 0x28e   : > { %2113 = vmatmul.msk.f32.vlgmr.msra.gmra.mxu2 %vm856_vm14, %v1500_v47 }
 0x28f   : > { %2125 = vmatpush.msk.msra.mxu2 %vm860_vm2, %v3069_v16  ;;  %1566 = vmatpush.msrb.mxu0 %v3209_v53 }
 0x291   : > { %1702 = vmatpush.msra.mxu2 %v3081_v27 }
 0x293   : > { %1703 = vmatpush.msra.mxu2 %v3091_v20  ;;  %v1845_v47 = vpop.f32.mrf.mxu1 }
 0x305   : > { %v1401_v9 = vpop.f32.mrf.mxu0 }
 0x309   : > { %v1425_v11 = vpop.f32.mrf.mxu2 }
 0x30a   : > { %v1426_v17 = vadd.f32 %v1425_v11, %v1401_v9 }
 0x30c   : > { %v1428_v19 = vmul.f32 0.5, %v1426_v17 }
 0x30e   : > { %vm1430_vm15 = vcmp.ge.f32.partialorder %v1428_v19, 1.0 }
 0x30f   : > { %v2106_v50 = vsel %vm1430_vm15, 1.0, %v2284_v38 }
 0x310   : > { %v1433_v1 = vsub.f32 1.0, %v2106_v50  ;;  %2108 = vmatmul.msk.f32.vlgmr.msra.gmra.mxu0 %vm1379_vm12, %v2106_v50 }
 0x311   : > { %1668 = vmatpush.msra.mxu0 %v2890_v4  ;;  %v1541_v22 = vpop.f32.mrf.mxu2  ;;  %v1660_v4 = vrot.slane %v1656_v40, 1 }
 0x312   : > { %v1434_v25 = vmul.f32 %v1433_v1, %v1428_v19  ;;  %v1542_v30 = vadd.f32 %v1541_v22, %v1521_v21 }
 0x313   : > { %1669 = vmatpush.msra.mxu0 %v2897_v5  ;;  %v1664_v5 = vsel %vm1137_vm1, %v1656_v40, %v1660_v4 }
 0x314   : > { %vm1544_vm0 = vcmp.ge.f32.partialorder %v1542_v30, 0.5 }
 0x315   : > { %v2114_v37 = vsel %vm1544_vm0, 1.0, %v2284_v38  ;;  %1670 = vmatpush.msra.mxu0 %v2904_v6  ;;  %v1651_v6 = vrot.slane %v3139_v55, 1 }
 0x316   : > { %v1548_v33 = vrot.slane %v2114_v37, 1  ;;  %2118 = vmatmul.msk.f32.vlgmr.msrb.gmra.mxu2 %vm1379_vm12, %v2114_v37 }
 0x317   : > { %1671 = vmatpush.msra.mxu0 %v2911_v7  ;;  %2130 = vmatpush.msk.msrb.mxu2 %vm860_vm2, %v3160_v34  ;;  %v1655_v7 = vadd.f32 %v3139_v55, %v1651_v6 }
 0x318   : > { %2116 = vmatmul.msk.f32.vlgmr.msrb.gmra.mxu0 %vm1379_vm12, %v1548_v33 }
 0x319   : > { %1672 = vmatpush.msra.mxu0 %v2918_v8  ;;  %1750 = vmatpush.msrb.mxu2 %v3179_v45  ;;  %v1659_v8 = vrot.slane %v1655_v7, 1 }
 0x31b   : > { %1673 = vmatpush.msra.mxu0 %v2925_v10  ;;  %1751 = vmatpush.msrb.mxu2 %v3193_v12  ;;  %v1663_v10 = vsel %vm1137_vm1, %v1655_v7, %v1659_v8 }
 0x31d   : > { %1674 = vmatpush.msra.mxu0 %v2934_v13  ;;  %1752 = vmatpush.msrb.mxu2 %v3203_v54 }
 0x31e   : > { %2126 = vmatmul.msk.f32.vlgmr.msra.gmra.mxu2 %vm856_vm14, %v1664_v5 }
 0x31f   : > { %1675 = vmatpush.msra.mxu0 %v2941_v14  ;;  %2138 = vmatpush.msk.msra.mxu2 %vm860_vm2, %v3069_v16 }
 0x321   : > { %1676 = vmatpush.msra.mxu0 %v2948_v15  ;;  %1862 = vmatpush.msra.mxu2 %v3081_v27 }
 0x323   : > { %1677 = vmatpush.msra.mxu0 %v2957_v18  ;;  %1863 = vmatpush.msra.mxu2 %v3091_v20 }
 0x325   : > { %1678 = vmatpush.msra.mxu0 %v2968_v23 }
 0x327   : > { %1679 = vmatpush.msra.mxu0 %v2976_v26 }
 0x329   : > { %1680 = vmatpush.msra.mxu0 %v2985_v28 }
 0x32b   : > { %1681 = vmatpush.msra.mxu0 %v2996_v31 }
 0x32d   : > { %1682 = vmatpush.msra.mxu0 %v3007_v36 }
 0x32f   : > { %1683 = vmatpush.msra.mxu0 %v3019_v41  ;;  %v2137_v41 = vsel %vm1804_vm4, 1.0, %v2284_v38 }
 0x330   : > { %1684 = vmatmul.f32.vlgmr.msra.gmra.mxu0 %v1663_v10  ;;  %v1812_v55 = vrot.slane %v2137_v41, 1 }
 0x332   : > { %v1816_v0 = vadd.f32 %v2137_v41, %v1812_v55 }
 0x334   : > { %v1820_v32 = vrot.slane %v1816_v0, 1 }
 0x336   : > { %v1824_v24 = vsel %vm1137_vm1, %v1816_v0, %v1820_v32 }
 0x38d   : > { %v1458_v13 = vpop.f32.mrf.mxu0 }
 0x395   : > { %v1568_v14 = vpop.f32.mrf.mxu0 }
 0x399   : > { %v1590_v15 = vpop.f32.mrf.mxu2 }
 0x39a   : > { %v1591_v18 = vadd.f32 %v1590_v15, %v1568_v14 }
 0x39c   : > { %v1593_v23 = vsub.f32 %v1591_v18, %v1434_v25 }
 0x39e   : > { %v1594_v26 = vmul.f32 0.5, %v1593_v23 }
 0x3a0   : > { %v1595_v16 = vadd.f32 %v1594_v26, %v1434_v25 }
 0x3a1   : > { %v1705_v27 = vpop.f32.mrf.mxu2 }
 0x3a2   : > { %vm1596_vm3 = vcmp.ge.f32.partialorder %v1595_v16, 1.0 }
 0x3a3   : > { %v2119_v28 = vsel %vm1596_vm3, 1.0, %v2284_v38 }
 0x3a4   : > { %2121 = vmatmul.msk.f32.vlgmr.msrb.gmra.mxu3 %vm1379_vm12, %v2119_v28  ;;  %v1599_v31 = vsub.f32 1.0, %v2119_v28 }
 0x3a5   : > { %2133 = vmatpush.msk.msrb.mxu3 %vm860_vm2, %v3219_v29 }
 0x3a6   : > { %v1600_v36 = vmul.f32 %v1599_v31, %v1595_v16 }
 0x3a7   : > { %1781 = vmatpush.msrb.mxu3 %v3224_v39 }
 0x3a9   : > { %1782 = vmatpush.msrb.mxu3 %v3251_v59 }
 0x3ab   : > { %1783 = vmatpush.msrb.mxu3 %v3256_v3 }
 0x3ad   : > { %v1685_v20 = vpop.f32.mrf.mxu0 }
 0x3ae   : > { %v1706_v46 = vadd.f32 %v1705_v27, %v1685_v20 }
 0x3b0   : > { %vm1708_vm5 = vcmp.ge.f32.partialorder %v1706_v46, 0.5 }
 0x3b1   : > { %v2127_v42 = vsel %vm1708_vm5, 1.0, %v2284_v38 }
 0x3b2   : > { %v1712_v48 = vrot.slane %v2127_v42, 1  ;;  %2131 = vmatmul.msk.f32.vlgmr.msrb.gmra.mxu2 %vm1379_vm12, %v2127_v42 }
 0x3b3   : > { %2143 = vmatpush.msk.msrb.mxu2 %vm860_vm2, %v3160_v34  ;;  %v1260_v34 = vld [vmem:[%s3394_s10] sm:$0x1] }
 0x3b4   : > { %2129 = vmatmul.msk.f32.vlgmr.msra.gmra.mxu3 %vm1379_vm12, %v1712_v48 }
 0x3b5   : > { %1910 = vmatpush.msrb.mxu2 %v3179_v45  ;;  %2141 = vmatpush.msk.msra.mxu3 %vm860_vm2, %v3174_v44  ;;  %v1459_v45 = vadd.f32 %v1458_v13, %v1260_v34 }
 0x3b7   : > { %1911 = vmatpush.msrb.mxu2 %v3193_v12  ;;  %1888 = vmatpush.msra.mxu3 %v3188_v49  ;;  %v1461_v44 = vmul.f32 0.5, %v1459_v45 }
 0x3b9   : > { %1912 = vmatpush.msrb.mxu2 %v3203_v54  ;;  %1889 = vmatpush.msra.mxu3 %v3198_v52  ;;  %vm1463_vm6 = vcmp.ge.f32.partialorder %v1461_v44, 1.0 }
 0x3ba   : > { %2139 = vmatmul.msk.f32.vlgmr.msra.gmra.mxu2 %vm856_vm14, %v1824_v24  ;;  %v2109_v12 = vsel %vm1463_vm6, 1.0, %v2284_v38 }
 0x3bb   : > { %1890 = vmatpush.msra.mxu3 %v3209_v53  ;;  %v1466_v49 = vsub.f32 1.0, %v2109_v12 }
 0x3bd   : > { %v1467_v35 = vmul.f32 %v1466_v49, %v1461_v44 }
 0x427   : > { %v1621_v51 = vpop.f32.mrf.mxu3 }
 0x428   : > { %v1622_v56 = vadd.f32 %v1621_v51, %v1260_v34 }
 0x42a   : > { %v1624_v54 = vsub.f32 %v1622_v56, %v1467_v35 }
 0x42c   : > { %v1625_v57 = vmul.f32 0.5, %v1624_v54 }
 0x42e   : > { %v1626_v52 = vadd.f32 %v1625_v57, %v1467_v35 }
 0x430   : > { %vm1627_vm1 = vcmp.ge.f32.partialorder %v1626_v52, 1.0 }
 0x431   : > { %v2122_v60 = vsel %vm1627_vm1, 1.0, %v2284_v38 }
 0x432   : > { %v1632_v53 = vadd.f32 %v2122_v60, %v2109_v12  ;;  %v1630_v58 = vsub.f32 1.0, %v2122_v60 }
 0x434   : > { %v1631_v30 = vmul.f32 %v1630_v58, %v1626_v52 }
 0x435   : > { %v1754_v61 = vpop.f32.mrf.mxu2 }
 0x437   : > { %v1732_v43 = vpop.f32.mrf.mxu3 }
 0x438   : > { %v1755_v62 = vadd.f32 %v1754_v61, %v1732_v43 }
 0x43a   : > { %v1757_v63 = vsub.f32 %v1755_v62, %v1600_v36 }
 0x43c   : > { %v1758_v2 = vmul.f32 0.5, %v1757_v63 }
 0x43d   : > { %v1865_v9 = vpop.f32.mrf.mxu2 }
 0x43e   : > { %v1759_v11 = vadd.f32 %v1758_v2, %v1600_v36  ;;  %v1866_v17 = vadd.f32 %v1865_v9, %v1845_v47 }
 0x440   : > { %vm1868_vm14 = vcmp.ge.f32.partialorder %v1866_v17, 0.5  ;;  %vm1760_vm7 = vcmp.ge.f32.partialorder %v1759_v11, 1.0 }
 0x441   : > { %v2140_v19 = vsel %vm1868_vm14, 1.0, %v2284_v38  ;;  %v2132_v50 = vsel %vm1760_vm7, 1.0, %v2284_v38 }
 0x442   : > { %2134 = vmatmul.msk.f32.vlgmr.msrb.gmra.mxu3 %vm1379_vm12, %v2132_v50  ;;  %2144 = vmatmul.msk.f32.vlgmr.msrb.gmra.mxu2 %vm1379_vm12, %v2140_v19  ;;  %v1763_v1 = vsub.f32 1.0, %v2132_v50  ;;  %v1872_v22 = vrot.slane %v2140_v19, 1 }
 0x443   : > { %2146 = vmatpush.msk.msrb.mxu3 %vm860_vm2, %v3219_v29 }
 0x444   : > { %v1764_v21 = vmul.f32 %v1763_v1, %v1759_v11 }
 0x445   : > { %1939 = vmatpush.msrb.mxu3 %v3224_v39 }
 0x447   : > { %1940 = vmatpush.msrb.mxu3 %v3251_v59 }
 0x449   : > { %1941 = vmatpush.msrb.mxu3 %v3256_v3 }
 0x44a   : > { %2142 = vmatmul.msk.f32.vlgmr.msra.gmra.mxu3 %vm1379_vm12, %v1872_v22 }
 0x4c5   : > { %v1785_v25 = vpop.f32.mrf.mxu3  ;;  %v1914_v5 = vpop.f32.mrf.mxu2 }
 0x4c6   : > { %v1786_v37 = vadd.f32 %v1785_v25, %v1260_v34 }
 0x4c8   : > { %v1788_v40 = vsub.f32 %v1786_v37, %v1631_v30 }
 0x4ca   : > { %v1789_v33 = vmul.f32 0.5, %v1788_v40 }
 0x4cc   : > { %v1790_v4 = vadd.f32 %v1789_v33, %v1631_v30 }
 0x4cd   : > { %v1892_v6 = vpop.f32.mrf.mxu3 }
 0x4ce   : > { %vm1791_vm2 = vcmp.ge.f32.partialorder %v1790_v4, 1.0  ;;  %v1915_v29 = vadd.f32 %v1914_v5, %v1892_v6 }
 0x4cf   : > { %v2135_v39 = vsel %vm1791_vm2, 1.0, %v2284_v38 }
 0x4d0   : > { %v1917_v59 = vsub.f32 %v1915_v29, %v1764_v21  ;;  %v1796_v7 = vadd.f32 %v2135_v39, %v1632_v53  ;;  %v1794_v13 = vsub.f32 1.0, %v2135_v39 }
 0x4d2   : > { %v1918_v3 = vmul.f32 0.5, %v1917_v59  ;;  %v1795_v15 = vmul.f32 %v1794_v13, %v1790_v4 }
 0x4d4   : > { %v1919_v8 = vadd.f32 %v1918_v3, %v1764_v21 }
 0x4d6   : > { %vm1920_vm8 = vcmp.ge.f32.partialorder %v1919_v8, 1.0 }
 0x4d7   : > { %v2145_v10 = vsel %vm1920_vm8, 1.0, %v2284_v38 }
 0x4d8   : > { %2147 = vmatmul.msk.f32.vlgmr.msrb.gmra.mxu3 %vm1379_vm12, %v2145_v10 }
 0x55b   : > { %v1943_v14 = vpop.f32.mrf.mxu3 }
 0x55c   : > { %v1944_v18 = vadd.f32 %v1943_v14, %v1260_v34 }
 0x55e   : > { %v1946_v23 = vsub.f32 %v1944_v18, %v1795_v15 }
 0x560   : > { %v1947_v26 = vmul.f32 0.5, %v1946_v23 }
 0x562   : > { %v1948_v16 = vadd.f32 %v1947_v26, %v1795_v15 }
 0x564   : > { %vm1949_vm9 = vcmp.ge.f32.partialorder %v1948_v16, 1.0 }
 0x565   : > { %v2148_v28 = vsel %vm1949_vm9, 1.0, %v2284_v38 }
 0x566   : > { %v1952_v31 = vadd.f32 %v2148_v28, %v1796_v7 }
 0x568   : > { %v1953_v36 = vmul.f32 0.25, %v1952_v31 }
 0x56a   : > { %1955 = vst.msk [vmem:[%s380_s18] sm:$0x1] %vm1954_vm10, %v1953_v36 }
 0x56b   : > { %2244 = shalt.err (!%p2241_p3)
}
 0x56c   : > { %2170 = dma.vmem_to_hbm [thread:$0]  (%p2387_p5), %s1968_s26, 16, %s1970_s12, %s1957_s15  }
 0x56d PF: > { %p2176_p4 = scmp.ge.s32.totalorder %s2279_s22, 2  ;;  %s1981_s0 = sand.u32 1, %s2267_s19  }
 0x56e   : > { %s1982_s16 = scalar_lea.sflag [#allocation4], %s1981_s0 }
 0x56f   : > { %p2173_p7 = pnand %p2176_p4, %p2391_p6 }
 0x571   : > { %p2174_p8 = pneg %p2173_p7 }
 0x573   : > { %2262 = dma.done.wait (%p2174_p8), %s1982_s16, 16  }
 0x574   : > { %2264 = vsyncadd (%p2174_p8), %s1982_s16, 4294967280  ;;  %p23_p9 = scmp.ge.s32.totalorder %s2374_s24, 4   ;;  %s3404_s19 = smov %s2271_s20 }
 0x575   : > { %s3405_s20 = smov %s2275_s21  ;;  %s3406_s21 = smov %s2385_s27 }
 0x576   : > { %s3407_s22 = smov %s2374_s24  ;;  %25 = sbr.rel (!%p23_p9) target bundleno = 6 (0x6), region = 103 }
 0x57b   :  { %1987 = vsyncpa [#allocation4], 1 }
 0x57c   :  { %1989 = vsyncpa [#allocation4 + $0x1], 1 }

</bundles_post_ra>
